<compile_context>
chip_gen: v5e
topology: v5e:2x2
jax: 0.10.0
libtpu: 0.0.40
codegen_flags: <defaults>
</compile_context>

<pallas_src>
import jax
import jax.numpy as jnp
from jax.experimental import pallas as pl
from jax.experimental.pallas import tpu as pltpu


# ----------------------------------------------------------------------------
# Fused seq2seq forward kernel (grid over batch tiles only).
# ----------------------------------------------------------------------------
def _seq2seq_kernel(src_ref, trg_ref,
                    enc_wih_ref, enc_whh_ref, enc_b_ref,
                    dec_wih_ref, dec_whh_ref, dec_b_ref,
                    e2d_w_ref, e2d_b_ref, d2v_w_ref, d2v_b_ref,
                    out_ref,
                    xproj_ref, h_all_ref):
    seq_len, tb, emb = src_ref.shape          # (T, batch_tile, E)
    h_src = enc_whh_ref.shape[0]
    h_trg = dec_whh_ref.shape[0]
    vocab = d2v_w_ref.shape[1]
    unroll = seq_len <= 32                    # fully unroll short recurrences

    def gate_act(gates, hdim):
        # PyTorch gate order (i, f, g, o); slices are free when hdim % 128 == 0.
        i_g = jax.nn.sigmoid(gates[:, 0:hdim])
        f_g = jax.nn.sigmoid(gates[:, hdim:2 * hdim])
        g_g = jnp.tanh(gates[:, 2 * hdim:3 * hdim])
        o_g = jax.nn.sigmoid(gates[:, 3 * hdim:4 * hdim])
        return i_g, f_g, g_g, o_g

    # ---- Encoder input projections: ONE big matmul, biases folded in. ------
    x_flat = src_ref[...].reshape(seq_len * tb, emb)
    xproj_ref[...] = (
        jnp.dot(x_flat, enc_wih_ref[...], preferred_element_type=jnp.float32)
        + enc_b_ref[...]).reshape(seq_len, tb, 4 * h_src)

    # ---- Encoder recurrence: only the final (h, c) is needed. --------------
    def enc_body(t, carry):
        h, c = carry
        gates = xproj_ref[t] + jnp.dot(
            h, enc_whh_ref[...], preferred_element_type=jnp.float32)
        i_g, f_g, g_g, o_g = gate_act(gates, h_src)
        c_new = f_g * c + i_g * g_g
        h_new = o_g * jnp.tanh(c_new)
        return h_new, c_new

    zeros = jnp.zeros((tb, h_src), jnp.float32)
    enc_h, enc_c = jax.lax.fori_loop(0, seq_len, enc_body, (zeros, zeros),
                                     unroll=unroll)

    # ---- Bridge: decoder_init_state = tanh(encoder2decoder(h_T)). ----------
    dec_h = jnp.tanh(
        jnp.dot(enc_h, e2d_w_ref[...], preferred_element_type=jnp.float32)
        + e2d_b_ref[...])
    dec_c = enc_c  # mirrors PyTorch c_t.view(...): requires h_src == h_trg

    # ---- Decoder input projections reuse the same scratch (h_src == h_trg).
    y_flat = trg_ref[...].reshape(seq_len * tb, emb)
    xproj_ref[...] = (
        jnp.dot(y_flat, dec_wih_ref[...], preferred_element_type=jnp.float32)
        + dec_b_ref[...]).reshape(seq_len, tb, 4 * h_trg)

    # ---- Decoder recurrence: only h @ W_hh + elementwise on the serial path.
    def dec_body(t, carry):
        h, c = carry
        gates = xproj_ref[t] + jnp.dot(
            h, dec_whh_ref[...], preferred_element_type=jnp.float32)
        i_g, f_g, g_g, o_g = gate_act(gates, h_trg)
        c_new = f_g * c + i_g * g_g
        h_new = o_g * jnp.tanh(c_new)
        h_all_ref[t] = h_new
        return h_new, c_new

    jax.lax.fori_loop(0, seq_len, dec_body, (dec_h, dec_c), unroll=unroll)

    # ---- Hoisted decoder2vocab: ONE (T*tb, Ht) @ (Ht, V) matmul. -----------
    # TODO(synk): tile over V for realistic vocab sizes (v7x 64 MiB VMEM).
    h_flat = h_all_ref[...].reshape(seq_len * tb, h_trg)
    logits = (
        jnp.dot(h_flat, d2v_w_ref[...], preferred_element_type=jnp.float32)
        + d2v_b_ref[...]).reshape(seq_len, tb, vocab)

    # Batch-major output block (tb, T, V): T static lane-dense slab stores,
    # so no (T,B,V)->(B,T,V) HBM transpose is needed outside the kernel.
    for t in range(seq_len):
        out_ref[:, t, :] = logits[t]


def seq2seq_forward(params, tokens, *, batch_tile=128):
    """tokens: (B, T) int32 -> decoder logits (B, T, V)."""
    B, T = tokens.shape
    E = params["src_embedding"].shape[1]
    Hs = params["enc_whh"].shape[0]
    Ht = params["dec_whh"].shape[0]
    V = params["d2v_w"].shape[1]
    # The dec_c = enc_c bridge (PyTorch's c_t.view) only makes sense if the
    # encoder and decoder hidden sizes match.
    assert Hs == Ht, "src_hidden_dim must equal trg_hidden_dim"

    def _round_up(x, m):
        return ((x + m - 1) // m) * m

    # Pad the batch to full f32 sublane groups; pick the batch tile.
    B8 = _round_up(B, 8)
    tb = max(8, (min(batch_tile, B8) // 8) * 8)
    # Give v7x's two TensorCores work when the batch allows >= 2 grid steps.
    if B8 // tb < 2 and B8 >= 16:
        tb = max(8, ((B8 // 2) // 8) * 8)
    B_pad = _round_up(B8, tb)

    # Transpose / pad the tiny int32 token matrix (not the activations).
    tok_tm = jnp.transpose(tokens, (1, 0))                      # (T, B)
    if B_pad != B:
        tok_tm = jnp.pad(tok_tm, ((0, 0), (0, B_pad - B)))

    # Embedding gathers (XLA glue) produce time-major activations directly.
    src_emb = jnp.take(params["src_embedding"], tok_tm, axis=0)  # (T, B_pad, E)
    trg_emb = jnp.take(params["trg_embedding"], tok_tm, axis=0)  # (T, B_pad, E)

    def full(shape):
        nd = len(shape)
        return pl.BlockSpec(shape, lambda b, _nd=nd: (0,) * _nd)

    grid_spec = pltpu.PrefetchScalarGridSpec(
        num_scalar_prefetch=0,
        grid=(B_pad // tb,),
        in_specs=[
            pl.BlockSpec((T, tb, E), lambda b: (0, b, 0)),   # src_emb tile
            pl.BlockSpec((T, tb, E), lambda b: (0, b, 0)),   # trg_emb tile
            full((E, 4 * Hs)),                               # enc W_ih (concat gates)
            full((Hs, 4 * Hs)),                              # enc W_hh
            full((1, 4 * Hs)),                               # enc bias (b_ih + b_hh)
            full((E, 4 * Ht)),                               # dec W_ih
            full((Ht, 4 * Ht)),                              # dec W_hh
            full((1, 4 * Ht)),                               # dec bias
            full((Hs, Ht)),                                  # encoder2decoder W
            full((1, Ht)),                                   # encoder2decoder b
            full((Ht, V)),                                   # decoder2vocab W
            full((1, V)),                                    # decoder2vocab b
        ],
        out_specs=pl.BlockSpec((tb, T, V), lambda b: (b, 0, 0)),
        scratch_shapes=[
            pltpu.VMEM((T, tb, 4 * Hs), jnp.float32),        # hoisted input proj
            pltpu.VMEM((T, tb, Ht), jnp.float32),            # decoder hidden states
        ],
    )

    logits = pl.pallas_call(
        _seq2seq_kernel,
        grid_spec=grid_spec,
        out_shape=jax.ShapeDtypeStruct((B_pad, T, V), jnp.float32),
        compiler_params=pltpu.CompilerParams(
            dimension_semantics=("parallel",),
            vmem_limit_bytes=56 * 1024 * 1024),
    )(src_emb, trg_emb,
      params["enc_wih"], params["enc_whh"], params["enc_b"],
      params["dec_wih"], params["dec_whh"], params["dec_b"],
      params["e2d_w"], params["e2d_b"], params["d2v_w"], params["d2v_b"])

    # Only remaining layout op in XLA: slice the padded batch rows off.
    return logits[:B]                                           # (B, T, V)


# ----------------------------------------------------------------------------
# Parameter init (matches the PyTorch module's init_weights semantics).
# Mapping from PyTorch weights: wih = W_ih.T, whh = W_hh.T (gate order i,f,g,o
# already concatenated along the output dim), b = (b_ih + b_hh)[None, :].
# ----------------------------------------------------------------------------
def init_params(key, vocab, emb, h_src, h_trg):
    ks = jax.random.split(key, 10)
    u = lambda k, shape, r=0.1: jax.random.uniform(k, shape, jnp.float32, -r, r)
    return {
        # nn.Embedding weights, uniform(-0.1, 0.1).
        "src_embedding": u(ks[0], (vocab, emb)),
        "trg_embedding": u(ks[1], (vocab, emb)),
        # Gate-concatenated LSTM weights (i, f, g, o along the last dim).
        "enc_wih": u(ks[2], (emb, 4 * h_src)),
        "enc_whh": u(ks[3], (h_src, 4 * h_src)),
        "enc_b":   u(ks[4], (1, 4 * h_src)),
        "dec_wih": u(ks[5], (emb, 4 * h_trg)),
        "dec_whh": u(ks[6], (h_trg, 4 * h_trg)),
        "dec_b":   u(ks[7], (1, 4 * h_trg)),
        # encoder2decoder / decoder2vocab Linear layers (bias zero per init_weights).
        "e2d_w": u(ks[8], (h_src, h_trg)),
        "e2d_b": jnp.zeros((1, h_trg), jnp.float32),
        "d2v_w": u(ks[9], (h_trg, vocab)),
        "d2v_b": jnp.zeros((1, vocab), jnp.float32),
    }


# ----------------------------------------------------------------------------
# Pure-JAX reference (same math) for verification.
# ----------------------------------------------------------------------------
def _ref_lstm(x_tm, wih, whh, b, h0, c0):
    H = whh.shape[0]

    def step(carry, x_t):
        h, c = carry
        gates = x_t @ wih + h @ whh + b
        i = jax.nn.sigmoid(gates[:, 0:H])
        f = jax.nn.sigmoid(gates[:, H:2 * H])
        g = jnp.tanh(gates[:, 2 * H:3 * H])
        o = jax.nn.sigmoid(gates[:, 3 * H:4 * H])
        c = f * c + i * g
        h = o * jnp.tanh(c)
        return (h, c), h

    (hT, cT), hs = jax.lax.scan(step, (h0, c0), x_tm)
    return hs, hT, cT


def ref_forward(params, tokens):
    B, T = tokens.shape
    Hs = params["enc_whh"].shape[0]
    src_emb = jnp.take(params["src_embedding"], tokens.T, axis=0)   # (T, B, E)
    trg_emb = jnp.take(params["trg_embedding"], tokens.T, axis=0)
    zeros = jnp.zeros((B, Hs), jnp.float32)
    _, h_t, c_t = _ref_lstm(src_emb, params["enc_wih"], params["enc_whh"],
                            params["enc_b"], zeros, zeros)
    dec_h0 = jnp.tanh(h_t @ params["e2d_w"] + params["e2d_b"])
    hs, _, _ = _ref_lstm(trg_emb, params["dec_wih"], params["dec_whh"],
                         params["dec_b"], dec_h0, c_t)               # (T, B, Ht)
    logits = jnp.einsum("tbh,hv->tbv", hs, params["d2v_w"]) + params["d2v_b"]
    return jnp.transpose(logits, (1, 0, 2))                          # (B, T, V)


if __name__ == "__main__":
    # Small shapes consistent with the module:
    #   src_vocab_size=32, src_emb_dim=trg_emb_dim=16,
    #   src_hidden_dim=trg_hidden_dim=32, batch=2, seq_len=8.
    B, T = 2, 8
    VOCAB, EMB, H_SRC, H_TRG = 32, 16, 32, 32

    key = jax.random.PRNGKey(0)
    k_tok, k_par = jax.random.split(key)
    tokens = jax.random.randint(k_tok, (B, T), 0, VOCAB, dtype=jnp.int32)
    params = init_params(k_par, VOCAB, EMB, H_SRC, H_TRG)

    fwd = jax.jit(seq2seq_forward)
    logits = fwd(params, tokens)
    jax.block_until_ready(logits)

    expected = ref_forward(params, tokens)
    assert logits.shape == (B, T, VOCAB)
    err = float(jnp.max(jnp.abs(logits - expected)))
    assert jnp.allclose(logits, expected, atol=1e-3, rtol=1e-3), err

    print("KERNEL_OK")
</pallas_src>

<mosaic_0001>
module attributes {stable_mosaic.version = 11 : i64} {
  func.func @_seq2seq_kernel(%arg0: i32, %arg1: memref<8x8x16xf32, #tpu.memory_space<vmem>>, %arg2: memref<8x8x16xf32, #tpu.memory_space<vmem>>, %arg3: memref<16x128xf32, #tpu.memory_space<vmem>>, %arg4: memref<32x128xf32, #tpu.memory_space<vmem>>, %arg5: memref<1x128xf32, #tpu.memory_space<vmem>>, %arg6: memref<16x128xf32, #tpu.memory_space<vmem>>, %arg7: memref<32x128xf32, #tpu.memory_space<vmem>>, %arg8: memref<1x128xf32, #tpu.memory_space<vmem>>, %arg9: memref<32x32xf32, #tpu.memory_space<vmem>>, %arg10: memref<1x32xf32, #tpu.memory_space<vmem>>, %arg11: memref<32x32xf32, #tpu.memory_space<vmem>>, %arg12: memref<1x32xf32, #tpu.memory_space<vmem>>, %arg13: memref<8x8x32xf32, #tpu.memory_space<vmem>>, %arg14: memref<8x8x128xf32, #tpu.memory_space<vmem>>, %arg15: memref<8x8x32xf32, #tpu.memory_space<vmem>>) attributes {dimension_semantics = [#tpu.dimension_semantics<parallel>], iteration_bounds = array<i64: 1>, scalar_prefetch = 0 : i64, scratch_operands = 2 : i64, tpu.core_type = #tpu.core_type<tc>, window_params = [{transform_indices = @transform_0, window_bounds = array<i64: 8, 8, 16>}, {transform_indices = @transform_1, window_bounds = array<i64: 8, 8, 16>}, {pipeline_mode = #tpu.pipeline_mode<synchronous>, transform_indices = @transform_2, window_bounds = array<i64: 16, 128>}, {pipeline_mode = #tpu.pipeline_mode<synchronous>, transform_indices = @transform_3, window_bounds = array<i64: 32, 128>}, {pipeline_mode = #tpu.pipeline_mode<synchronous>, transform_indices = @transform_4, window_bounds = array<i64: 1, 128>}, {pipeline_mode = #tpu.pipeline_mode<synchronous>, transform_indices = @transform_5, window_bounds = array<i64: 16, 128>}, {pipeline_mode = #tpu.pipeline_mode<synchronous>, transform_indices = @transform_6, window_bounds = array<i64: 32, 128>}, {pipeline_mode = #tpu.pipeline_mode<synchronous>, transform_indices = @transform_7, window_bounds = array<i64: 1, 128>}, {pipeline_mode = #tpu.pipeline_mode<synchronous>, transform_indices = @transform_8, window_bounds = array<i64: 32, 32>}, {pipeline_mode = #tpu.pipeline_mode<synchronous>, transform_indices = @transform_9, window_bounds = array<i64: 1, 32>}, {pipeline_mode = #tpu.pipeline_mode<synchronous>, transform_indices = @transform_10, window_bounds = array<i64: 32, 32>}, {pipeline_mode = #tpu.pipeline_mode<synchronous>, transform_indices = @transform_11, window_bounds = array<i64: 1, 32>}, {transform_indices = @transform_12, window_bounds = array<i64: 8, 8, 32>}]} {
    %c0 = arith.constant 0 : index
    %c0_0 = arith.constant 0 : index
    %c0_1 = arith.constant 0 : index
    %0 = vector.load %arg1[%c0, %c0_0, %c0_1] : memref<8x8x16xf32, #tpu.memory_space<vmem>>, vector<8x8x16xf32>
    %1 = vector.shape_cast %0 : vector<8x8x16xf32> to vector<64x16xf32>
    %c0_2 = arith.constant 0 : index
    %c0_3 = arith.constant 0 : index
    %2 = vector.load %arg3[%c0_2, %c0_3] : memref<16x128xf32, #tpu.memory_space<vmem>>, vector<16x128xf32>
    %cst = arith.constant dense<0.000000e+00> : vector<64x128xf32>
    %3 = tpu.matmul %1, %2, %cst {dimension_numbers = #tpu.dot_dimension_numbers<[1], [0], [0], [1], [0, 0, 1, 1], [], []>} : vector<64x16xf32>, vector<16x128xf32>, vector<64x128xf32> -> vector<64x128xf32>
    %c0_4 = arith.constant 0 : index
    %c0_5 = arith.constant 0 : index
    %4 = vector.load %arg5[%c0_4, %c0_5] : memref<1x128xf32, #tpu.memory_space<vmem>>, vector<1x128xf32>
    %5 = vector.broadcast %4 : vector<1x128xf32> to vector<64x128xf32>
    %6 = arith.addf %3, %5 : vector<64x128xf32>
    %7 = vector.shape_cast %6 : vector<64x128xf32> to vector<8x8x128xf32>
    %c0_6 = arith.constant 0 : index
    %c0_7 = arith.constant 0 : index
    %c0_8 = arith.constant 0 : index
    %8 = vector.load %arg14[%c0_6, %c0_7, %c0_8] : memref<8x8x128xf32, #tpu.memory_space<vmem>>, vector<8x8x128xf32>
    tpu.vector_store %arg14[%c0_6, %c0_7, %c0_8], %7 {strides = array<i32>} : memref<8x8x128xf32, #tpu.memory_space<vmem>>, vector<8x8x128xf32>,
    %cst_9 = arith.constant 0.000000e+00 : f32
    %9 = vector.broadcast %cst_9 : f32 to vector<8x32xf32>
    %c0_i32 = arith.constant 0 : i32
    %10 = arith.index_cast %c0_i32 : i32 to index
    %c0_10 = arith.constant 0 : index
    %c0_11 = arith.constant 0 : index
    %11 = vector.load %arg14[%10, %c0_10, %c0_11] : memref<8x8x128xf32, #tpu.memory_space<vmem>>, vector<1x8x128xf32>
    %12 = vector.shape_cast %11 : vector<1x8x128xf32> to vector<8x128xf32>
    %c0_12 = arith.constant 0 : index
    %c0_13 = arith.constant 0 : index
    %13 = vector.load %arg4[%c0_12, %c0_13] : memref<32x128xf32, #tpu.memory_space<vmem>>, vector<32x128xf32>
    %cst_14 = arith.constant dense<0.000000e+00> : vector<8x128xf32>
    %14 = tpu.matmul %9, %13, %cst_14 {dimension_numbers = #tpu.dot_dimension_numbers<[1], [0], [0], [1], [0, 0, 1, 1], [], []>} : vector<8x32xf32>, vector<32x128xf32>, vector<8x128xf32> -> vector<8x128xf32>
    %15 = arith.addf %12, %14 : vector<8x128xf32>
    %16 = vector.extract_strided_slice %15 {offsets = [0, 0], sizes = [8, 32], strides = [1, 1]} : vector<8x128xf32> to vector<8x32xf32>
    %17 = arith.negf %16 : vector<8x32xf32>
    %18 = math.exp %17 : vector<8x32xf32>
    %cst_15 = arith.constant 1.000000e+00 : f32
    %19 = vector.broadcast %cst_15 : f32 to vector<8x32xf32>
    %20 = arith.addf %19, %18 : vector<8x32xf32>
    %21 = arith.divf %19, %20 : vector<8x32xf32>
    %22 = vector.extract_strided_slice %15 {offsets = [0, 32], sizes = [8, 32], strides = [1, 1]} : vector<8x128xf32> to vector<8x32xf32>
    %23 = arith.negf %22 : vector<8x32xf32>
    %24 = math.exp %23 : vector<8x32xf32>
    %cst_16 = arith.constant 1.000000e+00 : f32
    %25 = vector.broadcast %cst_16 : f32 to vector<8x32xf32>
    %26 = arith.addf %25, %24 : vector<8x32xf32>
    %27 = arith.divf %25, %26 : vector<8x32xf32>
    %28 = vector.extract_strided_slice %15 {offsets = [0, 64], sizes = [8, 32], strides = [1, 1]} : vector<8x128xf32> to vector<8x32xf32>
    %29 = math.tanh %28 : vector<8x32xf32>
    %30 = vector.extract_strided_slice %15 {offsets = [0, 96], sizes = [8, 32], strides = [1, 1]} : vector<8x128xf32> to vector<8x32xf32>
    %31 = arith.negf %30 : vector<8x32xf32>
    %32 = math.exp %31 : vector<8x32xf32>
    %cst_17 = arith.constant 1.000000e+00 : f32
    %33 = vector.broadcast %cst_17 : f32 to vector<8x32xf32>
    %34 = arith.addf %33, %32 : vector<8x32xf32>
    %35 = arith.divf %33, %34 : vector<8x32xf32>
    %36 = arith.mulf %27, %9 : vector<8x32xf32>
    %37 = arith.mulf %21, %29 : vector<8x32xf32>
    %38 = arith.addf %36, %37 : vector<8x32xf32>
    %39 = math.tanh %38 : vector<8x32xf32>
    %40 = arith.mulf %35, %39 : vector<8x32xf32>
    %c1_i32 = arith.constant 1 : i32
    %41 = arith.index_cast %c1_i32 : i32 to index
    %c0_18 = arith.constant 0 : index
    %c0_19 = arith.constant 0 : index
    %42 = vector.load %arg14[%41, %c0_18, %c0_19] : memref<8x8x128xf32, #tpu.memory_space<vmem>>, vector<1x8x128xf32>
    %43 = vector.shape_cast %42 : vector<1x8x128xf32> to vector<8x128xf32>
    %c0_20 = arith.constant 0 : index
    %c0_21 = arith.constant 0 : index
    %44 = vector.load %arg4[%c0_20, %c0_21] : memref<32x128xf32, #tpu.memory_space<vmem>>, vector<32x128xf32>
    %cst_22 = arith.constant dense<0.000000e+00> : vector<8x128xf32>
    %45 = tpu.matmul %40, %44, %cst_22 {dimension_numbers = #tpu.dot_dimension_numbers<[1], [0], [0], [1], [0, 0, 1, 1], [], []>} : vector<8x32xf32>, vector<32x128xf32>, vector<8x128xf32> -> vector<8x128xf32>
    %46 = arith.addf %43, %45 : vector<8x128xf32>
    %47 = vector.extract_strided_slice %46 {offsets = [0, 0], sizes = [8, 32], strides = [1, 1]} : vector<8x128xf32> to vector<8x32xf32>
    %48 = arith.negf %47 : vector<8x32xf32>
    %49 = math.exp %48 : vector<8x32xf32>
    %cst_23 = arith.constant 1.000000e+00 : f32
    %50 = vector.broadcast %cst_23 : f32 to vector<8x32xf32>
    %51 = arith.addf %50, %49 : vector<8x32xf32>
    %52 = arith.divf %50, %51 : vector<8x32xf32>
    %53 = vector.extract_strided_slice %46 {offsets = [0, 32], sizes = [8, 32], strides = [1, 1]} : vector<8x128xf32> to vector<8x32xf32>
    %54 = arith.negf %53 : vector<8x32xf32>
    %55 = math.exp %54 : vector<8x32xf32>
    %cst_24 = arith.constant 1.000000e+00 : f32
    %56 = vector.broadcast %cst_24 : f32 to vector<8x32xf32>
    %57 = arith.addf %56, %55 : vector<8x32xf32>
    %58 = arith.divf %56, %57 : vector<8x32xf32>
    %59 = vector.extract_strided_slice %46 {offsets = [0, 64], sizes = [8, 32], strides = [1, 1]} : vector<8x128xf32> to vector<8x32xf32>
    %60 = math.tanh %59 : vector<8x32xf32>
    %61 = vector.extract_strided_slice %46 {offsets = [0, 96], sizes = [8, 32], strides = [1, 1]} : vector<8x128xf32> to vector<8x32xf32>
    %62 = arith.negf %61 : vector<8x32xf32>
    %63 = math.exp %62 : vector<8x32xf32>
    %cst_25 = arith.constant 1.000000e+00 : f32
    %64 = vector.broadcast %cst_25 : f32 to vector<8x32xf32>
    %65 = arith.addf %64, %63 : vector<8x32xf32>
    %66 = arith.divf %64, %65 : vector<8x32xf32>
    %67 = arith.mulf %58, %38 : vector<8x32xf32>
    %68 = arith.mulf %52, %60 : vector<8x32xf32>
    %69 = arith.addf %67, %68 : vector<8x32xf32>
    %70 = math.tanh %69 : vector<8x32xf32>
    %71 = arith.mulf %66, %70 : vector<8x32xf32>
    %c2_i32 = arith.constant 2 : i32
    %72 = arith.index_cast %c2_i32 : i32 to index
    %c0_26 = arith.constant 0 : index
    %c0_27 = arith.constant 0 : index
    %73 = vector.load %arg14[%72, %c0_26, %c0_27] : memref<8x8x128xf32, #tpu.memory_space<vmem>>, vector<1x8x128xf32>
    %74 = vector.shape_cast %73 : vector<1x8x128xf32> to vector<8x128xf32>
    %c0_28 = arith.constant 0 : index
    %c0_29 = arith.constant 0 : index
    %75 = vector.load %arg4[%c0_28, %c0_29] : memref<32x128xf32, #tpu.memory_space<vmem>>, vector<32x128xf32>
    %cst_30 = arith.constant dense<0.000000e+00> : vector<8x128xf32>
    %76 = tpu.matmul %71, %75, %cst_30 {dimension_numbers = #tpu.dot_dimension_numbers<[1], [0], [0], [1], [0, 0, 1, 1], [], []>} : vector<8x32xf32>, vector<32x128xf32>, vector<8x128xf32> -> vector<8x128xf32>
    %77 = arith.addf %74, %76 : vector<8x128xf32>
    %78 = vector.extract_strided_slice %77 {offsets = [0, 0], sizes = [8, 32], strides = [1, 1]} : vector<8x128xf32> to vector<8x32xf32>
    %79 = arith.negf %78 : vector<8x32xf32>
    %80 = math.exp %79 : vector<8x32xf32>
    %cst_31 = arith.constant 1.000000e+00 : f32
    %81 = vector.broadcast %cst_31 : f32 to vector<8x32xf32>
    %82 = arith.addf %81, %80 : vector<8x32xf32>
    %83 = arith.divf %81, %82 : vector<8x32xf32>
    %84 = vector.extract_strided_slice %77 {offsets = [0, 32], sizes = [8, 32], strides = [1, 1]} : vector<8x128xf32> to vector<8x32xf32>
    %85 = arith.negf %84 : vector<8x32xf32>
    %86 = math.exp %85 : vector<8x32xf32>
    %cst_32 = arith.constant 1.000000e+00 : f32
    %87 = vector.broadcast %cst_32 : f32 to vector<8x32xf32>
    %88 = arith.addf %87, %86 : vector<8x32xf32>
    %89 = arith.divf %87, %88 : vector<8x32xf32>
    %90 = vector.extract_strided_slice %77 {offsets = [0, 64], sizes = [8, 32], strides = [1, 1]} : vector<8x128xf32> to vector<8x32xf32>
    %91 = math.tanh %90 : vector<8x32xf32>
    %92 = vector.extract_strided_slice %77 {offsets = [0, 96], sizes = [8, 32], strides = [1, 1]} : vector<8x128xf32> to vector<8x32xf32>
    %93 = arith.negf %92 : vector<8x32xf32>
    %94 = math.exp %93 : vector<8x32xf32>
    %cst_33 = arith.constant 1.000000e+00 : f32
    %95 = vector.broadcast %cst_33 : f32 to vector<8x32xf32>
    %96 = arith.addf %95, %94 : vector<8x32xf32>
    %97 = arith.divf %95, %96 : vector<8x32xf32>
    %98 = arith.mulf %89, %69 : vector<8x32xf32>
    %99 = arith.mulf %83, %91 : vector<8x32xf32>
    %100 = arith.addf %98, %99 : vector<8x32xf32>
    %101 = math.tanh %100 : vector<8x32xf32>
    %102 = arith.mulf %97, %101 : vector<8x32xf32>
    %c3_i32 = arith.constant 3 : i32
    %103 = arith.index_cast %c3_i32 : i32 to index
    %c0_34 = arith.constant 0 : index
    %c0_35 = arith.constant 0 : index
    %104 = vector.load %arg14[%103, %c0_34, %c0_35] : memref<8x8x128xf32, #tpu.memory_space<vmem>>, vector<1x8x128xf32>
    %105 = vector.shape_cast %104 : vector<1x8x128xf32> to vector<8x128xf32>
    %c0_36 = arith.constant 0 : index
    %c0_37 = arith.constant 0 : index
    %106 = vector.load %arg4[%c0_36, %c0_37] : memref<32x128xf32, #tpu.memory_space<vmem>>, vector<32x128xf32>
    %cst_38 = arith.constant dense<0.000000e+00> : vector<8x128xf32>
    %107 = tpu.matmul %102, %106, %cst_38 {dimension_numbers = #tpu.dot_dimension_numbers<[1], [0], [0], [1], [0, 0, 1, 1], [], []>} : vector<8x32xf32>, vector<32x128xf32>, vector<8x128xf32> -> vector<8x128xf32>
    %108 = arith.addf %105, %107 : vector<8x128xf32>
    %109 = vector.extract_strided_slice %108 {offsets = [0, 0], sizes = [8, 32], strides = [1, 1]} : vector<8x128xf32> to vector<8x32xf32>
    %110 = arith.negf %109 : vector<8x32xf32>
    %111 = math.exp %110 : vector<8x32xf32>
    %cst_39 = arith.constant 1.000000e+00 : f32
    %112 = vector.broadcast %cst_39 : f32 to vector<8x32xf32>
    %113 = arith.addf %112, %111 : vector<8x32xf32>
    %114 = arith.divf %112, %113 : vector<8x32xf32>
    %115 = vector.extract_strided_slice %108 {offsets = [0, 32], sizes = [8, 32], strides = [1, 1]} : vector<8x128xf32> to vector<8x32xf32>
    %116 = arith.negf %115 : vector<8x32xf32>
    %117 = math.exp %116 : vector<8x32xf32>
    %cst_40 = arith.constant 1.000000e+00 : f32
    %118 = vector.broadcast %cst_40 : f32 to vector<8x32xf32>
    %119 = arith.addf %118, %117 : vector<8x32xf32>
    %120 = arith.divf %118, %119 : vector<8x32xf32>
    %121 = vector.extract_strided_slice %108 {offsets = [0, 64], sizes = [8, 32], strides = [1, 1]} : vector<8x128xf32> to vector<8x32xf32>
    %122 = math.tanh %121 : vector<8x32xf32>
    %123 = vector.extract_strided_slice %108 {offsets = [0, 96], sizes = [8, 32], strides = [1, 1]} : vector<8x128xf32> to vector<8x32xf32>
    %124 = arith.negf %123 : vector<8x32xf32>
    %125 = math.exp %124 : vector<8x32xf32>
    %cst_41 = arith.constant 1.000000e+00 : f32
    %126 = vector.broadcast %cst_41 : f32 to vector<8x32xf32>
    %127 = arith.addf %126, %125 : vector<8x32xf32>
    %128 = arith.divf %126, %127 : vector<8x32xf32>
    %129 = arith.mulf %120, %100 : vector<8x32xf32>
    %130 = arith.mulf %114, %122 : vector<8x32xf32>
    %131 = arith.addf %129, %130 : vector<8x32xf32>
    %132 = math.tanh %131 : vector<8x32xf32>
    %133 = arith.mulf %128, %132 : vector<8x32xf32>
    %c4_i32 = arith.constant 4 : i32
    %134 = arith.index_cast %c4_i32 : i32 to index
    %c0_42 = arith.constant 0 : index
    %c0_43 = arith.constant 0 : index
    %135 = vector.load %arg14[%134, %c0_42, %c0_43] : memref<8x8x128xf32, #tpu.memory_space<vmem>>, vector<1x8x128xf32>
    %136 = vector.shape_cast %135 : vector<1x8x128xf32> to vector<8x128xf32>
    %c0_44 = arith.constant 0 : index
    %c0_45 = arith.constant 0 : index
    %137 = vector.load %arg4[%c0_44, %c0_45] : memref<32x128xf32, #tpu.memory_space<vmem>>, vector<32x128xf32>
    %cst_46 = arith.constant dense<0.000000e+00> : vector<8x128xf32>
    %138 = tpu.matmul %133, %137, %cst_46 {dimension_numbers = #tpu.dot_dimension_numbers<[1], [0], [0], [1], [0, 0, 1, 1], [], []>} : vector<8x32xf32>, vector<32x128xf32>, vector<8x128xf32> -> vector<8x128xf32>
    %139 = arith.addf %136, %138 : vector<8x128xf32>
    %140 = vector.extract_strided_slice %139 {offsets = [0, 0], sizes = [8, 32], strides = [1, 1]} : vector<8x128xf32> to vector<8x32xf32>
    %141 = arith.negf %140 : vector<8x32xf32>
    %142 = math.exp %141 : vector<8x32xf32>
    %cst_47 = arith.constant 1.000000e+00 : f32
    %143 = vector.broadcast %cst_47 : f32 to vector<8x32xf32>
    %144 = arith.addf %143, %142 : vector<8x32xf32>
    %145 = arith.divf %143, %144 : vector<8x32xf32>
    %146 = vector.extract_strided_slice %139 {offsets = [0, 32], sizes = [8, 32], strides = [1, 1]} : vector<8x128xf32> to vector<8x32xf32>
    %147 = arith.negf %146 : vector<8x32xf32>
    %148 = math.exp %147 : vector<8x32xf32>
    %cst_48 = arith.constant 1.000000e+00 : f32
    %149 = vector.broadcast %cst_48 : f32 to vector<8x32xf32>
    %150 = arith.addf %149, %148 : vector<8x32xf32>
    %151 = arith.divf %149, %150 : vector<8x32xf32>
    %152 = vector.extract_strided_slice %139 {offsets = [0, 64], sizes = [8, 32], strides = [1, 1]} : vector<8x128xf32> to vector<8x32xf32>
    %153 = math.tanh %152 : vector<8x32xf32>
    %154 = vector.extract_strided_slice %139 {offsets = [0, 96], sizes = [8, 32], strides = [1, 1]} : vector<8x128xf32> to vector<8x32xf32>
    %155 = arith.negf %154 : vector<8x32xf32>
    %156 = math.exp %155 : vector<8x32xf32>
    %cst_49 = arith.constant 1.000000e+00 : f32
    %157 = vector.broadcast %cst_49 : f32 to vector<8x32xf32>
    %158 = arith.addf %157, %156 : vector<8x32xf32>
    %159 = arith.divf %157, %158 : vector<8x32xf32>
    %160 = arith.mulf %151, %131 : vector<8x32xf32>
    %161 = arith.mulf %145, %153 : vector<8x32xf32>
    %162 = arith.addf %160, %161 : vector<8x32xf32>
    %163 = math.tanh %162 : vector<8x32xf32>
    %164 = arith.mulf %159, %163 : vector<8x32xf32>
    %c5_i32 = arith.constant 5 : i32
    %165 = arith.index_cast %c5_i32 : i32 to index
    %c0_50 = arith.constant 0 : index
    %c0_51 = arith.constant 0 : index
    %166 = vector.load %arg14[%165, %c0_50, %c0_51] : memref<8x8x128xf32, #tpu.memory_space<vmem>>, vector<1x8x128xf32>
    %167 = vector.shape_cast %166 : vector<1x8x128xf32> to vector<8x128xf32>
    %c0_52 = arith.constant 0 : index
    %c0_53 = arith.constant 0 : index
    %168 = vector.load %arg4[%c0_52, %c0_53] : memref<32x128xf32, #tpu.memory_space<vmem>>, vector<32x128xf32>
    %cst_54 = arith.constant dense<0.000000e+00> : vector<8x128xf32>
    %169 = tpu.matmul %164, %168, %cst_54 {dimension_numbers = #tpu.dot_dimension_numbers<[1], [0], [0], [1], [0, 0, 1, 1], [], []>} : vector<8x32xf32>, vector<32x128xf32>, vector<8x128xf32> -> vector<8x128xf32>
    %170 = arith.addf %167, %169 : vector<8x128xf32>
    %171 = vector.extract_strided_slice %170 {offsets = [0, 0], sizes = [8, 32], strides = [1, 1]} : vector<8x128xf32> to vector<8x32xf32>
    %172 = arith.negf %171 : vector<8x32xf32>
    %173 = math.exp %172 : vector<8x32xf32>
    %cst_55 = arith.constant 1.000000e+00 : f32
    %174 = vector.broadcast %cst_55 : f32 to vector<8x32xf32>
    %175 = arith.addf %174, %173 : vector<8x32xf32>
    %176 = arith.divf %174, %175 : vector<8x32xf32>
    %177 = vector.extract_strided_slice %170 {offsets = [0, 32], sizes = [8, 32], strides = [1, 1]} : vector<8x128xf32> to vector<8x32xf32>
    %178 = arith.negf %177 : vector<8x32xf32>
    %179 = math.exp %178 : vector<8x32xf32>
    %cst_56 = arith.constant 1.000000e+00 : f32
    %180 = vector.broadcast %cst_56 : f32 to vector<8x32xf32>
    %181 = arith.addf %180, %179 : vector<8x32xf32>
    %182 = arith.divf %180, %181 : vector<8x32xf32>
    %183 = vector.extract_strided_slice %170 {offsets = [0, 64], sizes = [8, 32], strides = [1, 1]} : vector<8x128xf32> to vector<8x32xf32>
    %184 = math.tanh %183 : vector<8x32xf32>
    %185 = vector.extract_strided_slice %170 {offsets = [0, 96], sizes = [8, 32], strides = [1, 1]} : vector<8x128xf32> to vector<8x32xf32>
    %186 = arith.negf %185 : vector<8x32xf32>
    %187 = math.exp %186 : vector<8x32xf32>
    %cst_57 = arith.constant 1.000000e+00 : f32
    %188 = vector.broadcast %cst_57 : f32 to vector<8x32xf32>
    %189 = arith.addf %188, %187 : vector<8x32xf32>
    %190 = arith.divf %188, %189 : vector<8x32xf32>
    %191 = arith.mulf %182, %162 : vector<8x32xf32>
    %192 = arith.mulf %176, %184 : vector<8x32xf32>
    %193 = arith.addf %191, %192 : vector<8x32xf32>
    %194 = math.tanh %193 : vector<8x32xf32>
    %195 = arith.mulf %190, %194 : vector<8x32xf32>
    %c6_i32 = arith.constant 6 : i32
    %196 = arith.index_cast %c6_i32 : i32 to index
    %c0_58 = arith.constant 0 : index
    %c0_59 = arith.constant 0 : index
    %197 = vector.load %arg14[%196, %c0_58, %c0_59] : memref<8x8x128xf32, #tpu.memory_space<vmem>>, vector<1x8x128xf32>
    %198 = vector.shape_cast %197 : vector<1x8x128xf32> to vector<8x128xf32>
    %c0_60 = arith.constant 0 : index
    %c0_61 = arith.constant 0 : index
    %199 = vector.load %arg4[%c0_60, %c0_61] : memref<32x128xf32, #tpu.memory_space<vmem>>, vector<32x128xf32>
    %cst_62 = arith.constant dense<0.000000e+00> : vector<8x128xf32>
    %200 = tpu.matmul %195, %199, %cst_62 {dimension_numbers = #tpu.dot_dimension_numbers<[1], [0], [0], [1], [0, 0, 1, 1], [], []>} : vector<8x32xf32>, vector<32x128xf32>, vector<8x128xf32> -> vector<8x128xf32>
    %201 = arith.addf %198, %200 : vector<8x128xf32>
    %202 = vector.extract_strided_slice %201 {offsets = [0, 0], sizes = [8, 32], strides = [1, 1]} : vector<8x128xf32> to vector<8x32xf32>
    %203 = arith.negf %202 : vector<8x32xf32>
    %204 = math.exp %203 : vector<8x32xf32>
    %cst_63 = arith.constant 1.000000e+00 : f32
    %205 = vector.broadcast %cst_63 : f32 to vector<8x32xf32>
    %206 = arith.addf %205, %204 : vector<8x32xf32>
    %207 = arith.divf %205, %206 : vector<8x32xf32>
    %208 = vector.extract_strided_slice %201 {offsets = [0, 32], sizes = [8, 32], strides = [1, 1]} : vector<8x128xf32> to vector<8x32xf32>
    %209 = arith.negf %208 : vector<8x32xf32>
    %210 = math.exp %209 : vector<8x32xf32>
    %cst_64 = arith.constant 1.000000e+00 : f32
    %211 = vector.broadcast %cst_64 : f32 to vector<8x32xf32>
    %212 = arith.addf %211, %210 : vector<8x32xf32>
    %213 = arith.divf %211, %212 : vector<8x32xf32>
    %214 = vector.extract_strided_slice %201 {offsets = [0, 64], sizes = [8, 32], strides = [1, 1]} : vector<8x128xf32> to vector<8x32xf32>
    %215 = math.tanh %214 : vector<8x32xf32>
    %216 = vector.extract_strided_slice %201 {offsets = [0, 96], sizes = [8, 32], strides = [1, 1]} : vector<8x128xf32> to vector<8x32xf32>
    %217 = arith.negf %216 : vector<8x32xf32>
    %218 = math.exp %217 : vector<8x32xf32>
    %cst_65 = arith.constant 1.000000e+00 : f32
    %219 = vector.broadcast %cst_65 : f32 to vector<8x32xf32>
    %220 = arith.addf %219, %218 : vector<8x32xf32>
    %221 = arith.divf %219, %220 : vector<8x32xf32>
    %222 = arith.mulf %213, %193 : vector<8x32xf32>
    %223 = arith.mulf %207, %215 : vector<8x32xf32>
    %224 = arith.addf %222, %223 : vector<8x32xf32>
    %225 = math.tanh %224 : vector<8x32xf32>
    %226 = arith.mulf %221, %225 : vector<8x32xf32>
    %c7_i32 = arith.constant 7 : i32
    %227 = arith.index_cast %c7_i32 : i32 to index
    %c0_66 = arith.constant 0 : index
    %c0_67 = arith.constant 0 : index
    %228 = vector.load %arg14[%227, %c0_66, %c0_67] : memref<8x8x128xf32, #tpu.memory_space<vmem>>, vector<1x8x128xf32>
    %229 = vector.shape_cast %228 : vector<1x8x128xf32> to vector<8x128xf32>
    %c0_68 = arith.constant 0 : index
    %c0_69 = arith.constant 0 : index
    %230 = vector.load %arg4[%c0_68, %c0_69] : memref<32x128xf32, #tpu.memory_space<vmem>>, vector<32x128xf32>
    %cst_70 = arith.constant dense<0.000000e+00> : vector<8x128xf32>
    %231 = tpu.matmul %226, %230, %cst_70 {dimension_numbers = #tpu.dot_dimension_numbers<[1], [0], [0], [1], [0, 0, 1, 1], [], []>} : vector<8x32xf32>, vector<32x128xf32>, vector<8x128xf32> -> vector<8x128xf32>
    %232 = arith.addf %229, %231 : vector<8x128xf32>
    %233 = vector.extract_strided_slice %232 {offsets = [0, 0], sizes = [8, 32], strides = [1, 1]} : vector<8x128xf32> to vector<8x32xf32>
    %234 = arith.negf %233 : vector<8x32xf32>
    %235 = math.exp %234 : vector<8x32xf32>
    %cst_71 = arith.constant 1.000000e+00 : f32
    %236 = vector.broadcast %cst_71 : f32 to vector<8x32xf32>
    %237 = arith.addf %236, %235 : vector<8x32xf32>
    %238 = arith.divf %236, %237 : vector<8x32xf32>
    %239 = vector.extract_strided_slice %232 {offsets = [0, 32], sizes = [8, 32], strides = [1, 1]} : vector<8x128xf32> to vector<8x32xf32>
    %240 = arith.negf %239 : vector<8x32xf32>
    %241 = math.exp %240 : vector<8x32xf32>
    %cst_72 = arith.constant 1.000000e+00 : f32
    %242 = vector.broadcast %cst_72 : f32 to vector<8x32xf32>
    %243 = arith.addf %242, %241 : vector<8x32xf32>
    %244 = arith.divf %242, %243 : vector<8x32xf32>
    %245 = vector.extract_strided_slice %232 {offsets = [0, 64], sizes = [8, 32], strides = [1, 1]} : vector<8x128xf32> to vector<8x32xf32>
    %246 = math.tanh %245 : vector<8x32xf32>
    %247 = vector.extract_strided_slice %232 {offsets = [0, 96], sizes = [8, 32], strides = [1, 1]} : vector<8x128xf32> to vector<8x32xf32>
    %248 = arith.negf %247 : vector<8x32xf32>
    %249 = math.exp %248 : vector<8x32xf32>
    %cst_73 = arith.constant 1.000000e+00 : f32
    %250 = vector.broadcast %cst_73 : f32 to vector<8x32xf32>
    %251 = arith.addf %250, %249 : vector<8x32xf32>
    %252 = arith.divf %250, %251 : vector<8x32xf32>
    %253 = arith.mulf %244, %224 : vector<8x32xf32>
    %254 = arith.mulf %238, %246 : vector<8x32xf32>
    %255 = arith.addf %253, %254 : vector<8x32xf32>
    %256 = math.tanh %255 : vector<8x32xf32>
    %257 = arith.mulf %252, %256 : vector<8x32xf32>
    %c8_i32 = arith.constant 8 : i32
    %c0_74 = arith.constant 0 : index
    %c0_75 = arith.constant 0 : index
    %258 = vector.load %arg9[%c0_74, %c0_75] : memref<32x32xf32, #tpu.memory_space<vmem>>, vector<32x32xf32>
    %cst_76 = arith.constant dense<0.000000e+00> : vector<8x32xf32>
    %259 = tpu.matmul %257, %258, %cst_76 {dimension_numbers = #tpu.dot_dimension_numbers<[1], [0], [0], [1], [0, 0, 1, 1], [], []>} : vector<8x32xf32>, vector<32x32xf32>, vector<8x32xf32> -> vector<8x32xf32>
    %c0_77 = arith.constant 0 : index
    %c0_78 = arith.constant 0 : index
    %260 = vector.load %arg10[%c0_77, %c0_78] : memref<1x32xf32, #tpu.memory_space<vmem>>, vector<1x32xf32>
    %261 = vector.broadcast %260 : vector<1x32xf32> to vector<8x32xf32>
    %262 = arith.addf %259, %261 : vector<8x32xf32>
    %263 = math.tanh %262 : vector<8x32xf32>
    %c0_79 = arith.constant 0 : index
    %c0_80 = arith.constant 0 : index
    %c0_81 = arith.constant 0 : index
    %264 = vector.load %arg2[%c0_79, %c0_80, %c0_81] : memref<8x8x16xf32, #tpu.memory_space<vmem>>, vector<8x8x16xf32>
    %265 = vector.shape_cast %264 : vector<8x8x16xf32> to vector<64x16xf32>
    %c0_82 = arith.constant 0 : index
    %c0_83 = arith.constant 0 : index
    %266 = vector.load %arg6[%c0_82, %c0_83] : memref<16x128xf32, #tpu.memory_space<vmem>>, vector<16x128xf32>
    %cst_84 = arith.constant dense<0.000000e+00> : vector<64x128xf32>
    %267 = tpu.matmul %265, %266, %cst_84 {dimension_numbers = #tpu.dot_dimension_numbers<[1], [0], [0], [1], [0, 0, 1, 1], [], []>} : vector<64x16xf32>, vector<16x128xf32>, vector<64x128xf32> -> vector<64x128xf32>
    %c0_85 = arith.constant 0 : index
    %c0_86 = arith.constant 0 : index
    %268 = vector.load %arg8[%c0_85, %c0_86] : memref<1x128xf32, #tpu.memory_space<vmem>>, vector<1x128xf32>
    %269 = vector.broadcast %268 : vector<1x128xf32> to vector<64x128xf32>
    %270 = arith.addf %267, %269 : vector<64x128xf32>
    %271 = vector.shape_cast %270 : vector<64x128xf32> to vector<8x8x128xf32>
    %c0_87 = arith.constant 0 : index
    %c0_88 = arith.constant 0 : index
    %c0_89 = arith.constant 0 : index
    %272 = vector.load %arg14[%c0_87, %c0_88, %c0_89] : memref<8x8x128xf32, #tpu.memory_space<vmem>>, vector<8x8x128xf32>
    tpu.vector_store %arg14[%c0_87, %c0_88, %c0_89], %271 {strides = array<i32>} : memref<8x8x128xf32, #tpu.memory_space<vmem>>, vector<8x8x128xf32>,
    %c0_i32_90 = arith.constant 0 : i32
    %273 = arith.index_cast %c0_i32_90 : i32 to index
    %c0_91 = arith.constant 0 : index
    %c0_92 = arith.constant 0 : index
    %274 = vector.load %arg14[%273, %c0_91, %c0_92] : memref<8x8x128xf32, #tpu.memory_space<vmem>>, vector<1x8x128xf32>
    %275 = vector.shape_cast %274 : vector<1x8x128xf32> to vector<8x128xf32>
    %c0_93 = arith.constant 0 : index
    %c0_94 = arith.constant 0 : index
    %276 = vector.load %arg7[%c0_93, %c0_94] : memref<32x128xf32, #tpu.memory_space<vmem>>, vector<32x128xf32>
    %cst_95 = arith.constant dense<0.000000e+00> : vector<8x128xf32>
    %277 = tpu.matmul %263, %276, %cst_95 {dimension_numbers = #tpu.dot_dimension_numbers<[1], [0], [0], [1], [0, 0, 1, 1], [], []>} : vector<8x32xf32>, vector<32x128xf32>, vector<8x128xf32> -> vector<8x128xf32>
    %278 = arith.addf %275, %277 : vector<8x128xf32>
    %279 = vector.extract_strided_slice %278 {offsets = [0, 0], sizes = [8, 32], strides = [1, 1]} : vector<8x128xf32> to vector<8x32xf32>
    %280 = arith.negf %279 : vector<8x32xf32>
    %281 = math.exp %280 : vector<8x32xf32>
    %cst_96 = arith.constant 1.000000e+00 : f32
    %282 = vector.broadcast %cst_96 : f32 to vector<8x32xf32>
    %283 = arith.addf %282, %281 : vector<8x32xf32>
    %284 = arith.divf %282, %283 : vector<8x32xf32>
    %285 = vector.extract_strided_slice %278 {offsets = [0, 32], sizes = [8, 32], strides = [1, 1]} : vector<8x128xf32> to vector<8x32xf32>
    %286 = arith.negf %285 : vector<8x32xf32>
    %287 = math.exp %286 : vector<8x32xf32>
    %cst_97 = arith.constant 1.000000e+00 : f32
    %288 = vector.broadcast %cst_97 : f32 to vector<8x32xf32>
    %289 = arith.addf %288, %287 : vector<8x32xf32>
    %290 = arith.divf %288, %289 : vector<8x32xf32>
    %291 = vector.extract_strided_slice %278 {offsets = [0, 64], sizes = [8, 32], strides = [1, 1]} : vector<8x128xf32> to vector<8x32xf32>
    %292 = math.tanh %291 : vector<8x32xf32>
    %293 = vector.extract_strided_slice %278 {offsets = [0, 96], sizes = [8, 32], strides = [1, 1]} : vector<8x128xf32> to vector<8x32xf32>
    %294 = arith.negf %293 : vector<8x32xf32>
    %295 = math.exp %294 : vector<8x32xf32>
    %cst_98 = arith.constant 1.000000e+00 : f32
    %296 = vector.broadcast %cst_98 : f32 to vector<8x32xf32>
    %297 = arith.addf %296, %295 : vector<8x32xf32>
    %298 = arith.divf %296, %297 : vector<8x32xf32>
    %299 = arith.mulf %290, %255 : vector<8x32xf32>
    %300 = arith.mulf %284, %292 : vector<8x32xf32>
    %301 = arith.addf %299, %300 : vector<8x32xf32>
    %302 = math.tanh %301 : vector<8x32xf32>
    %303 = arith.mulf %298, %302 : vector<8x32xf32>
    %304 = arith.index_cast %c0_i32_90 : i32 to index
    %c0_99 = arith.constant 0 : index
    %c0_100 = arith.constant 0 : index
    %305 = vector.load %arg15[%304, %c0_99, %c0_100] : memref<8x8x32xf32, #tpu.memory_space<vmem>>, vector<1x8x32xf32>
    %306 = vector.shape_cast %305 : vector<1x8x32xf32> to vector<8x32xf32>
    %307 = vector.shape_cast %303 : vector<8x32xf32> to vector<1x8x32xf32>
    tpu.vector_store %arg15[%304, %c0_99, %c0_100], %307 {strides = array<i32>} : memref<8x8x32xf32, #tpu.memory_space<vmem>>, vector<1x8x32xf32>,
    %c1_i32_101 = arith.constant 1 : i32
    %308 = arith.index_cast %c1_i32_101 : i32 to index
    %c0_102 = arith.constant 0 : index
    %c0_103 = arith.constant 0 : index
    %309 = vector.load %arg14[%308, %c0_102, %c0_103] : memref<8x8x128xf32, #tpu.memory_space<vmem>>, vector<1x8x128xf32>
    %310 = vector.shape_cast %309 : vector<1x8x128xf32> to vector<8x128xf32>
    %c0_104 = arith.constant 0 : index
    %c0_105 = arith.constant 0 : index
    %311 = vector.load %arg7[%c0_104, %c0_105] : memref<32x128xf32, #tpu.memory_space<vmem>>, vector<32x128xf32>
    %cst_106 = arith.constant dense<0.000000e+00> : vector<8x128xf32>
    %312 = tpu.matmul %303, %311, %cst_106 {dimension_numbers = #tpu.dot_dimension_numbers<[1], [0], [0], [1], [0, 0, 1, 1], [], []>} : vector<8x32xf32>, vector<32x128xf32>, vector<8x128xf32> -> vector<8x128xf32>
    %313 = arith.addf %310, %312 : vector<8x128xf32>
    %314 = vector.extract_strided_slice %313 {offsets = [0, 0], sizes = [8, 32], strides = [1, 1]} : vector<8x128xf32> to vector<8x32xf32>
    %315 = arith.negf %314 : vector<8x32xf32>
    %316 = math.exp %315 : vector<8x32xf32>
    %cst_107 = arith.constant 1.000000e+00 : f32
    %317 = vector.broadcast %cst_107 : f32 to vector<8x32xf32>
    %318 = arith.addf %317, %316 : vector<8x32xf32>
    %319 = arith.divf %317, %318 : vector<8x32xf32>
    %320 = vector.extract_strided_slice %313 {offsets = [0, 32], sizes = [8, 32], strides = [1, 1]} : vector<8x128xf32> to vector<8x32xf32>
    %321 = arith.negf %320 : vector<8x32xf32>
    %322 = math.exp %321 : vector<8x32xf32>
    %cst_108 = arith.constant 1.000000e+00 : f32
    %323 = vector.broadcast %cst_108 : f32 to vector<8x32xf32>
    %324 = arith.addf %323, %322 : vector<8x32xf32>
    %325 = arith.divf %323, %324 : vector<8x32xf32>
    %326 = vector.extract_strided_slice %313 {offsets = [0, 64], sizes = [8, 32], strides = [1, 1]} : vector<8x128xf32> to vector<8x32xf32>
    %327 = math.tanh %326 : vector<8x32xf32>
    %328 = vector.extract_strided_slice %313 {offsets = [0, 96], sizes = [8, 32], strides = [1, 1]} : vector<8x128xf32> to vector<8x32xf32>
    %329 = arith.negf %328 : vector<8x32xf32>
    %330 = math.exp %329 : vector<8x32xf32>
    %cst_109 = arith.constant 1.000000e+00 : f32
    %331 = vector.broadcast %cst_109 : f32 to vector<8x32xf32>
    %332 = arith.addf %331, %330 : vector<8x32xf32>
    %333 = arith.divf %331, %332 : vector<8x32xf32>
    %334 = arith.mulf %325, %301 : vector<8x32xf32>
    %335 = arith.mulf %319, %327 : vector<8x32xf32>
    %336 = arith.addf %334, %335 : vector<8x32xf32>
    %337 = math.tanh %336 : vector<8x32xf32>
    %338 = arith.mulf %333, %337 : vector<8x32xf32>
    %339 = arith.index_cast %c1_i32_101 : i32 to index
    %c0_110 = arith.constant 0 : index
    %c0_111 = arith.constant 0 : index
    %340 = vector.load %arg15[%339, %c0_110, %c0_111] : memref<8x8x32xf32, #tpu.memory_space<vmem>>, vector<1x8x32xf32>
    %341 = vector.shape_cast %340 : vector<1x8x32xf32> to vector<8x32xf32>
    %342 = vector.shape_cast %338 : vector<8x32xf32> to vector<1x8x32xf32>
    tpu.vector_store %arg15[%339, %c0_110, %c0_111], %342 {strides = array<i32>} : memref<8x8x32xf32, #tpu.memory_space<vmem>>, vector<1x8x32xf32>,
    %c2_i32_112 = arith.constant 2 : i32
    %343 = arith.index_cast %c2_i32_112 : i32 to index
    %c0_113 = arith.constant 0 : index
    %c0_114 = arith.constant 0 : index
    %344 = vector.load %arg14[%343, %c0_113, %c0_114] : memref<8x8x128xf32, #tpu.memory_space<vmem>>, vector<1x8x128xf32>
    %345 = vector.shape_cast %344 : vector<1x8x128xf32> to vector<8x128xf32>
    %c0_115 = arith.constant 0 : index
    %c0_116 = arith.constant 0 : index
    %346 = vector.load %arg7[%c0_115, %c0_116] : memref<32x128xf32, #tpu.memory_space<vmem>>, vector<32x128xf32>
    %cst_117 = arith.constant dense<0.000000e+00> : vector<8x128xf32>
    %347 = tpu.matmul %338, %346, %cst_117 {dimension_numbers = #tpu.dot_dimension_numbers<[1], [0], [0], [1], [0, 0, 1, 1], [], []>} : vector<8x32xf32>, vector<32x128xf32>, vector<8x128xf32> -> vector<8x128xf32>
    %348 = arith.addf %345, %347 : vector<8x128xf32>
    %349 = vector.extract_strided_slice %348 {offsets = [0, 0], sizes = [8, 32], strides = [1, 1]} : vector<8x128xf32> to vector<8x32xf32>
    %350 = arith.negf %349 : vector<8x32xf32>
    %351 = math.exp %350 : vector<8x32xf32>
    %cst_118 = arith.constant 1.000000e+00 : f32
    %352 = vector.broadcast %cst_118 : f32 to vector<8x32xf32>
    %353 = arith.addf %352, %351 : vector<8x32xf32>
    %354 = arith.divf %352, %353 : vector<8x32xf32>
    %355 = vector.extract_strided_slice %348 {offsets = [0, 32], sizes = [8, 32], strides = [1, 1]} : vector<8x128xf32> to vector<8x32xf32>
    %356 = arith.negf %355 : vector<8x32xf32>
    %357 = math.exp %356 : vector<8x32xf32>
    %cst_119 = arith.constant 1.000000e+00 : f32
    %358 = vector.broadcast %cst_119 : f32 to vector<8x32xf32>
    %359 = arith.addf %358, %357 : vector<8x32xf32>
    %360 = arith.divf %358, %359 : vector<8x32xf32>
    %361 = vector.extract_strided_slice %348 {offsets = [0, 64], sizes = [8, 32], strides = [1, 1]} : vector<8x128xf32> to vector<8x32xf32>
    %362 = math.tanh %361 : vector<8x32xf32>
    %363 = vector.extract_strided_slice %348 {offsets = [0, 96], sizes = [8, 32], strides = [1, 1]} : vector<8x128xf32> to vector<8x32xf32>
    %364 = arith.negf %363 : vector<8x32xf32>
    %365 = math.exp %364 : vector<8x32xf32>
    %cst_120 = arith.constant 1.000000e+00 : f32
    %366 = vector.broadcast %cst_120 : f32 to vector<8x32xf32>
    %367 = arith.addf %366, %365 : vector<8x32xf32>
    %368 = arith.divf %366, %367 : vector<8x32xf32>
    %369 = arith.mulf %360, %336 : vector<8x32xf32>
    %370 = arith.mulf %354, %362 : vector<8x32xf32>
    %371 = arith.addf %369, %370 : vector<8x32xf32>
    %372 = math.tanh %371 : vector<8x32xf32>
    %373 = arith.mulf %368, %372 : vector<8x32xf32>
    %374 = arith.index_cast %c2_i32_112 : i32 to index
    %c0_121 = arith.constant 0 : index
    %c0_122 = arith.constant 0 : index
    %375 = vector.load %arg15[%374, %c0_121, %c0_122] : memref<8x8x32xf32, #tpu.memory_space<vmem>>, vector<1x8x32xf32>
    %376 = vector.shape_cast %375 : vector<1x8x32xf32> to vector<8x32xf32>
    %377 = vector.shape_cast %373 : vector<8x32xf32> to vector<1x8x32xf32>
    tpu.vector_store %arg15[%374, %c0_121, %c0_122], %377 {strides = array<i32>} : memref<8x8x32xf32, #tpu.memory_space<vmem>>, vector<1x8x32xf32>,
    %c3_i32_123 = arith.constant 3 : i32
    %378 = arith.index_cast %c3_i32_123 : i32 to index
    %c0_124 = arith.constant 0 : index
    %c0_125 = arith.constant 0 : index
    %379 = vector.load %arg14[%378, %c0_124, %c0_125] : memref<8x8x128xf32, #tpu.memory_space<vmem>>, vector<1x8x128xf32>
    %380 = vector.shape_cast %379 : vector<1x8x128xf32> to vector<8x128xf32>
    %c0_126 = arith.constant 0 : index
    %c0_127 = arith.constant 0 : index
    %381 = vector.load %arg7[%c0_126, %c0_127] : memref<32x128xf32, #tpu.memory_space<vmem>>, vector<32x128xf32>
    %cst_128 = arith.constant dense<0.000000e+00> : vector<8x128xf32>
    %382 = tpu.matmul %373, %381, %cst_128 {dimension_numbers = #tpu.dot_dimension_numbers<[1], [0], [0], [1], [0, 0, 1, 1], [], []>} : vector<8x32xf32>, vector<32x128xf32>, vector<8x128xf32> -> vector<8x128xf32>
    %383 = arith.addf %380, %382 : vector<8x128xf32>
    %384 = vector.extract_strided_slice %383 {offsets = [0, 0], sizes = [8, 32], strides = [1, 1]} : vector<8x128xf32> to vector<8x32xf32>
    %385 = arith.negf %384 : vector<8x32xf32>
    %386 = math.exp %385 : vector<8x32xf32>
    %cst_129 = arith.constant 1.000000e+00 : f32
    %387 = vector.broadcast %cst_129 : f32 to vector<8x32xf32>
    %388 = arith.addf %387, %386 : vector<8x32xf32>
    %389 = arith.divf %387, %388 : vector<8x32xf32>
    %390 = vector.extract_strided_slice %383 {offsets = [0, 32], sizes = [8, 32], strides = [1, 1]} : vector<8x128xf32> to vector<8x32xf32>
    %391 = arith.negf %390 : vector<8x32xf32>
    %392 = math.exp %391 : vector<8x32xf32>
    %cst_130 = arith.constant 1.000000e+00 : f32
    %393 = vector.broadcast %cst_130 : f32 to vector<8x32xf32>
    %394 = arith.addf %393, %392 : vector<8x32xf32>
    %395 = arith.divf %393, %394 : vector<8x32xf32>
    %396 = vector.extract_strided_slice %383 {offsets = [0, 64], sizes = [8, 32], strides = [1, 1]} : vector<8x128xf32> to vector<8x32xf32>
    %397 = math.tanh %396 : vector<8x32xf32>
    %398 = vector.extract_strided_slice %383 {offsets = [0, 96], sizes = [8, 32], strides = [1, 1]} : vector<8x128xf32> to vector<8x32xf32>
    %399 = arith.negf %398 : vector<8x32xf32>
    %400 = math.exp %399 : vector<8x32xf32>
    %cst_131 = arith.constant 1.000000e+00 : f32
    %401 = vector.broadcast %cst_131 : f32 to vector<8x32xf32>
    %402 = arith.addf %401, %400 : vector<8x32xf32>
    %403 = arith.divf %401, %402 : vector<8x32xf32>
    %404 = arith.mulf %395, %371 : vector<8x32xf32>
    %405 = arith.mulf %389, %397 : vector<8x32xf32>
    %406 = arith.addf %404, %405 : vector<8x32xf32>
    %407 = math.tanh %406 : vector<8x32xf32>
    %408 = arith.mulf %403, %407 : vector<8x32xf32>
    %409 = arith.index_cast %c3_i32_123 : i32 to index
    %c0_132 = arith.constant 0 : index
    %c0_133 = arith.constant 0 : index
    %410 = vector.load %arg15[%409, %c0_132, %c0_133] : memref<8x8x32xf32, #tpu.memory_space<vmem>>, vector<1x8x32xf32>
    %411 = vector.shape_cast %410 : vector<1x8x32xf32> to vector<8x32xf32>
    %412 = vector.shape_cast %408 : vector<8x32xf32> to vector<1x8x32xf32>
    tpu.vector_store %arg15[%409, %c0_132, %c0_133], %412 {strides = array<i32>} : memref<8x8x32xf32, #tpu.memory_space<vmem>>, vector<1x8x32xf32>,
    %c4_i32_134 = arith.constant 4 : i32
    %413 = arith.index_cast %c4_i32_134 : i32 to index
    %c0_135 = arith.constant 0 : index
    %c0_136 = arith.constant 0 : index
    %414 = vector.load %arg14[%413, %c0_135, %c0_136] : memref<8x8x128xf32, #tpu.memory_space<vmem>>, vector<1x8x128xf32>
    %415 = vector.shape_cast %414 : vector<1x8x128xf32> to vector<8x128xf32>
    %c0_137 = arith.constant 0 : index
    %c0_138 = arith.constant 0 : index
    %416 = vector.load %arg7[%c0_137, %c0_138] : memref<32x128xf32, #tpu.memory_space<vmem>>, vector<32x128xf32>
    %cst_139 = arith.constant dense<0.000000e+00> : vector<8x128xf32>
    %417 = tpu.matmul %408, %416, %cst_139 {dimension_numbers = #tpu.dot_dimension_numbers<[1], [0], [0], [1], [0, 0, 1, 1], [], []>} : vector<8x32xf32>, vector<32x128xf32>, vector<8x128xf32> -> vector<8x128xf32>
    %418 = arith.addf %415, %417 : vector<8x128xf32>
    %419 = vector.extract_strided_slice %418 {offsets = [0, 0], sizes = [8, 32], strides = [1, 1]} : vector<8x128xf32> to vector<8x32xf32>
    %420 = arith.negf %419 : vector<8x32xf32>
    %421 = math.exp %420 : vector<8x32xf32>
    %cst_140 = arith.constant 1.000000e+00 : f32
    %422 = vector.broadcast %cst_140 : f32 to vector<8x32xf32>
    %423 = arith.addf %422, %421 : vector<8x32xf32>
    %424 = arith.divf %422, %423 : vector<8x32xf32>
    %425 = vector.extract_strided_slice %418 {offsets = [0, 32], sizes = [8, 32], strides = [1, 1]} : vector<8x128xf32> to vector<8x32xf32>
    %426 = arith.negf %425 : vector<8x32xf32>
    %427 = math.exp %426 : vector<8x32xf32>
    %cst_141 = arith.constant 1.000000e+00 : f32
    %428 = vector.broadcast %cst_141 : f32 to vector<8x32xf32>
    %429 = arith.addf %428, %427 : vector<8x32xf32>
    %430 = arith.divf %428, %429 : vector<8x32xf32>
    %431 = vector.extract_strided_slice %418 {offsets = [0, 64], sizes = [8, 32], strides = [1, 1]} : vector<8x128xf32> to vector<8x32xf32>
    %432 = math.tanh %431 : vector<8x32xf32>
    %433 = vector.extract_strided_slice %418 {offsets = [0, 96], sizes = [8, 32], strides = [1, 1]} : vector<8x128xf32> to vector<8x32xf32>
    %434 = arith.negf %433 : vector<8x32xf32>
    %435 = math.exp %434 : vector<8x32xf32>
    %cst_142 = arith.constant 1.000000e+00 : f32
    %436 = vector.broadcast %cst_142 : f32 to vector<8x32xf32>
    %437 = arith.addf %436, %435 : vector<8x32xf32>
    %438 = arith.divf %436, %437 : vector<8x32xf32>
    %439 = arith.mulf %430, %406 : vector<8x32xf32>
    %440 = arith.mulf %424, %432 : vector<8x32xf32>
    %441 = arith.addf %439, %440 : vector<8x32xf32>
    %442 = math.tanh %441 : vector<8x32xf32>
    %443 = arith.mulf %438, %442 : vector<8x32xf32>
    %444 = arith.index_cast %c4_i32_134 : i32 to index
    %c0_143 = arith.constant 0 : index
    %c0_144 = arith.constant 0 : index
    %445 = vector.load %arg15[%444, %c0_143, %c0_144] : memref<8x8x32xf32, #tpu.memory_space<vmem>>, vector<1x8x32xf32>
    %446 = vector.shape_cast %445 : vector<1x8x32xf32> to vector<8x32xf32>
    %447 = vector.shape_cast %443 : vector<8x32xf32> to vector<1x8x32xf32>
    tpu.vector_store %arg15[%444, %c0_143, %c0_144], %447 {strides = array<i32>} : memref<8x8x32xf32, #tpu.memory_space<vmem>>, vector<1x8x32xf32>,
    %c5_i32_145 = arith.constant 5 : i32
    %448 = arith.index_cast %c5_i32_145 : i32 to index
    %c0_146 = arith.constant 0 : index
    %c0_147 = arith.constant 0 : index
    %449 = vector.load %arg14[%448, %c0_146, %c0_147] : memref<8x8x128xf32, #tpu.memory_space<vmem>>, vector<1x8x128xf32>
    %450 = vector.shape_cast %449 : vector<1x8x128xf32> to vector<8x128xf32>
    %c0_148 = arith.constant 0 : index
    %c0_149 = arith.constant 0 : index
    %451 = vector.load %arg7[%c0_148, %c0_149] : memref<32x128xf32, #tpu.memory_space<vmem>>, vector<32x128xf32>
    %cst_150 = arith.constant dense<0.000000e+00> : vector<8x128xf32>
    %452 = tpu.matmul %443, %451, %cst_150 {dimension_numbers = #tpu.dot_dimension_numbers<[1], [0], [0], [1], [0, 0, 1, 1], [], []>} : vector<8x32xf32>, vector<32x128xf32>, vector<8x128xf32> -> vector<8x128xf32>
    %453 = arith.addf %450, %452 : vector<8x128xf32>
    %454 = vector.extract_strided_slice %453 {offsets = [0, 0], sizes = [8, 32], strides = [1, 1]} : vector<8x128xf32> to vector<8x32xf32>
    %455 = arith.negf %454 : vector<8x32xf32>
    %456 = math.exp %455 : vector<8x32xf32>
    %cst_151 = arith.constant 1.000000e+00 : f32
    %457 = vector.broadcast %cst_151 : f32 to vector<8x32xf32>
    %458 = arith.addf %457, %456 : vector<8x32xf32>
    %459 = arith.divf %457, %458 : vector<8x32xf32>
    %460 = vector.extract_strided_slice %453 {offsets = [0, 32], sizes = [8, 32], strides = [1, 1]} : vector<8x128xf32> to vector<8x32xf32>
    %461 = arith.negf %460 : vector<8x32xf32>
    %462 = math.exp %461 : vector<8x32xf32>
    %cst_152 = arith.constant 1.000000e+00 : f32
    %463 = vector.broadcast %cst_152 : f32 to vector<8x32xf32>
    %464 = arith.addf %463, %462 : vector<8x32xf32>
    %465 = arith.divf %463, %464 : vector<8x32xf32>
    %466 = vector.extract_strided_slice %453 {offsets = [0, 64], sizes = [8, 32], strides = [1, 1]} : vector<8x128xf32> to vector<8x32xf32>
    %467 = math.tanh %466 : vector<8x32xf32>
    %468 = vector.extract_strided_slice %453 {offsets = [0, 96], sizes = [8, 32], strides = [1, 1]} : vector<8x128xf32> to vector<8x32xf32>
    %469 = arith.negf %468 : vector<8x32xf32>
    %470 = math.exp %469 : vector<8x32xf32>
    %cst_153 = arith.constant 1.000000e+00 : f32
    %471 = vector.broadcast %cst_153 : f32 to vector<8x32xf32>
    %472 = arith.addf %471, %470 : vector<8x32xf32>
    %473 = arith.divf %471, %472 : vector<8x32xf32>
    %474 = arith.mulf %465, %441 : vector<8x32xf32>
    %475 = arith.mulf %459, %467 : vector<8x32xf32>
    %476 = arith.addf %474, %475 : vector<8x32xf32>
    %477 = math.tanh %476 : vector<8x32xf32>
    %478 = arith.mulf %473, %477 : vector<8x32xf32>
    %479 = arith.index_cast %c5_i32_145 : i32 to index
    %c0_154 = arith.constant 0 : index
    %c0_155 = arith.constant 0 : index
    %480 = vector.load %arg15[%479, %c0_154, %c0_155] : memref<8x8x32xf32, #tpu.memory_space<vmem>>, vector<1x8x32xf32>
    %481 = vector.shape_cast %480 : vector<1x8x32xf32> to vector<8x32xf32>
    %482 = vector.shape_cast %478 : vector<8x32xf32> to vector<1x8x32xf32>
    tpu.vector_store %arg15[%479, %c0_154, %c0_155], %482 {strides = array<i32>} : memref<8x8x32xf32, #tpu.memory_space<vmem>>, vector<1x8x32xf32>,
    %c6_i32_156 = arith.constant 6 : i32
    %483 = arith.index_cast %c6_i32_156 : i32 to index
    %c0_157 = arith.constant 0 : index
    %c0_158 = arith.constant 0 : index
    %484 = vector.load %arg14[%483, %c0_157, %c0_158] : memref<8x8x128xf32, #tpu.memory_space<vmem>>, vector<1x8x128xf32>
    %485 = vector.shape_cast %484 : vector<1x8x128xf32> to vector<8x128xf32>
    %c0_159 = arith.constant 0 : index
    %c0_160 = arith.constant 0 : index
    %486 = vector.load %arg7[%c0_159, %c0_160] : memref<32x128xf32, #tpu.memory_space<vmem>>, vector<32x128xf32>
    %cst_161 = arith.constant dense<0.000000e+00> : vector<8x128xf32>
    %487 = tpu.matmul %478, %486, %cst_161 {dimension_numbers = #tpu.dot_dimension_numbers<[1], [0], [0], [1], [0, 0, 1, 1], [], []>} : vector<8x32xf32>, vector<32x128xf32>, vector<8x128xf32> -> vector<8x128xf32>
    %488 = arith.addf %485, %487 : vector<8x128xf32>
    %489 = vector.extract_strided_slice %488 {offsets = [0, 0], sizes = [8, 32], strides = [1, 1]} : vector<8x128xf32> to vector<8x32xf32>
    %490 = arith.negf %489 : vector<8x32xf32>
    %491 = math.exp %490 : vector<8x32xf32>
    %cst_162 = arith.constant 1.000000e+00 : f32
    %492 = vector.broadcast %cst_162 : f32 to vector<8x32xf32>
    %493 = arith.addf %492, %491 : vector<8x32xf32>
    %494 = arith.divf %492, %493 : vector<8x32xf32>
    %495 = vector.extract_strided_slice %488 {offsets = [0, 32], sizes = [8, 32], strides = [1, 1]} : vector<8x128xf32> to vector<8x32xf32>
    %496 = arith.negf %495 : vector<8x32xf32>
    %497 = math.exp %496 : vector<8x32xf32>
    %cst_163 = arith.constant 1.000000e+00 : f32
    %498 = vector.broadcast %cst_163 : f32 to vector<8x32xf32>
    %499 = arith.addf %498, %497 : vector<8x32xf32>
    %500 = arith.divf %498, %499 : vector<8x32xf32>
    %501 = vector.extract_strided_slice %488 {offsets = [0, 64], sizes = [8, 32], strides = [1, 1]} : vector<8x128xf32> to vector<8x32xf32>
    %502 = math.tanh %501 : vector<8x32xf32>
    %503 = vector.extract_strided_slice %488 {offsets = [0, 96], sizes = [8, 32], strides = [1, 1]} : vector<8x128xf32> to vector<8x32xf32>
    %504 = arith.negf %503 : vector<8x32xf32>
    %505 = math.exp %504 : vector<8x32xf32>
    %cst_164 = arith.constant 1.000000e+00 : f32
    %506 = vector.broadcast %cst_164 : f32 to vector<8x32xf32>
    %507 = arith.addf %506, %505 : vector<8x32xf32>
    %508 = arith.divf %506, %507 : vector<8x32xf32>
    %509 = arith.mulf %500, %476 : vector<8x32xf32>
    %510 = arith.mulf %494, %502 : vector<8x32xf32>
    %511 = arith.addf %509, %510 : vector<8x32xf32>
    %512 = math.tanh %511 : vector<8x32xf32>
    %513 = arith.mulf %508, %512 : vector<8x32xf32>
    %514 = arith.index_cast %c6_i32_156 : i32 to index
    %c0_165 = arith.constant 0 : index
    %c0_166 = arith.constant 0 : index
    %515 = vector.load %arg15[%514, %c0_165, %c0_166] : memref<8x8x32xf32, #tpu.memory_space<vmem>>, vector<1x8x32xf32>
    %516 = vector.shape_cast %515 : vector<1x8x32xf32> to vector<8x32xf32>
    %517 = vector.shape_cast %513 : vector<8x32xf32> to vector<1x8x32xf32>
    tpu.vector_store %arg15[%514, %c0_165, %c0_166], %517 {strides = array<i32>} : memref<8x8x32xf32, #tpu.memory_space<vmem>>, vector<1x8x32xf32>,
    %c7_i32_167 = arith.constant 7 : i32
    %518 = arith.index_cast %c7_i32_167 : i32 to index
    %c0_168 = arith.constant 0 : index
    %c0_169 = arith.constant 0 : index
    %519 = vector.load %arg14[%518, %c0_168, %c0_169] : memref<8x8x128xf32, #tpu.memory_space<vmem>>, vector<1x8x128xf32>
    %520 = vector.shape_cast %519 : vector<1x8x128xf32> to vector<8x128xf32>
    %c0_170 = arith.constant 0 : index
    %c0_171 = arith.constant 0 : index
    %521 = vector.load %arg7[%c0_170, %c0_171] : memref<32x128xf32, #tpu.memory_space<vmem>>, vector<32x128xf32>
    %cst_172 = arith.constant dense<0.000000e+00> : vector<8x128xf32>
    %522 = tpu.matmul %513, %521, %cst_172 {dimension_numbers = #tpu.dot_dimension_numbers<[1], [0], [0], [1], [0, 0, 1, 1], [], []>} : vector<8x32xf32>, vector<32x128xf32>, vector<8x128xf32> -> vector<8x128xf32>
    %523 = arith.addf %520, %522 : vector<8x128xf32>
    %524 = vector.extract_strided_slice %523 {offsets = [0, 0], sizes = [8, 32], strides = [1, 1]} : vector<8x128xf32> to vector<8x32xf32>
    %525 = arith.negf %524 : vector<8x32xf32>
    %526 = math.exp %525 : vector<8x32xf32>
    %cst_173 = arith.constant 1.000000e+00 : f32
    %527 = vector.broadcast %cst_173 : f32 to vector<8x32xf32>
    %528 = arith.addf %527, %526 : vector<8x32xf32>
    %529 = arith.divf %527, %528 : vector<8x32xf32>
    %530 = vector.extract_strided_slice %523 {offsets = [0, 32], sizes = [8, 32], strides = [1, 1]} : vector<8x128xf32> to vector<8x32xf32>
    %531 = arith.negf %530 : vector<8x32xf32>
    %532 = math.exp %531 : vector<8x32xf32>
    %cst_174 = arith.constant 1.000000e+00 : f32
    %533 = vector.broadcast %cst_174 : f32 to vector<8x32xf32>
    %534 = arith.addf %533, %532 : vector<8x32xf32>
    %535 = arith.divf %533, %534 : vector<8x32xf32>
    %536 = vector.extract_strided_slice %523 {offsets = [0, 64], sizes = [8, 32], strides = [1, 1]} : vector<8x128xf32> to vector<8x32xf32>
    %537 = math.tanh %536 : vector<8x32xf32>
    %538 = vector.extract_strided_slice %523 {offsets = [0, 96], sizes = [8, 32], strides = [1, 1]} : vector<8x128xf32> to vector<8x32xf32>
    %539 = arith.negf %538 : vector<8x32xf32>
    %540 = math.exp %539 : vector<8x32xf32>
    %cst_175 = arith.constant 1.000000e+00 : f32
    %541 = vector.broadcast %cst_175 : f32 to vector<8x32xf32>
    %542 = arith.addf %541, %540 : vector<8x32xf32>
    %543 = arith.divf %541, %542 : vector<8x32xf32>
    %544 = arith.mulf %535, %511 : vector<8x32xf32>
    %545 = arith.mulf %529, %537 : vector<8x32xf32>
    %546 = arith.addf %544, %545 : vector<8x32xf32>
    %547 = math.tanh %546 : vector<8x32xf32>
    %548 = arith.mulf %543, %547 : vector<8x32xf32>
    %549 = arith.index_cast %c7_i32_167 : i32 to index
    %c0_176 = arith.constant 0 : index
    %c0_177 = arith.constant 0 : index
    %550 = vector.load %arg15[%549, %c0_176, %c0_177] : memref<8x8x32xf32, #tpu.memory_space<vmem>>, vector<1x8x32xf32>
    %551 = vector.shape_cast %550 : vector<1x8x32xf32> to vector<8x32xf32>
    %552 = vector.shape_cast %548 : vector<8x32xf32> to vector<1x8x32xf32>
    tpu.vector_store %arg15[%549, %c0_176, %c0_177], %552 {strides = array<i32>} : memref<8x8x32xf32, #tpu.memory_space<vmem>>, vector<1x8x32xf32>,
    %c8_i32_178 = arith.constant 8 : i32
    %c0_179 = arith.constant 0 : index
    %c0_180 = arith.constant 0 : index
    %c0_181 = arith.constant 0 : index
    %553 = vector.load %arg15[%c0_179, %c0_180, %c0_181] : memref<8x8x32xf32, #tpu.memory_space<vmem>>, vector<8x8x32xf32>
    %554 = vector.shape_cast %553 : vector<8x8x32xf32> to vector<64x32xf32>
    %c0_182 = arith.constant 0 : index
    %c0_183 = arith.constant 0 : index
    %555 = vector.load %arg11[%c0_182, %c0_183] : memref<32x32xf32, #tpu.memory_space<vmem>>, vector<32x32xf32>
    %cst_184 = arith.constant dense<0.000000e+00> : vector<64x32xf32>
    %556 = tpu.matmul %554, %555, %cst_184 {dimension_numbers = #tpu.dot_dimension_numbers<[1], [0], [0], [1], [0, 0, 1, 1], [], []>} : vector<64x32xf32>, vector<32x32xf32>, vector<64x32xf32> -> vector<64x32xf32>
    %c0_185 = arith.constant 0 : index
    %c0_186 = arith.constant 0 : index
    %557 = vector.load %arg12[%c0_185, %c0_186] : memref<1x32xf32, #tpu.memory_space<vmem>>, vector<1x32xf32>
    %558 = vector.broadcast %557 : vector<1x32xf32> to vector<64x32xf32>
    %559 = arith.addf %556, %558 : vector<64x32xf32>
    %560 = vector.shape_cast %559 : vector<64x32xf32> to vector<8x8x32xf32>
    %561 = vector.extract_strided_slice %560 {offsets = [0, 0, 0], sizes = [1, 8, 32], strides = [1, 1, 1]} : vector<8x8x32xf32> to vector<1x8x32xf32>
    %562 = vector.shape_cast %561 : vector<1x8x32xf32> to vector<8x32xf32>
    %c0_187 = arith.constant 0 : index
    %c0_188 = arith.constant 0 : index
    %c0_189 = arith.constant 0 : index
    %563 = vector.load %arg13[%c0_187, %c0_188, %c0_189] : memref<8x8x32xf32, #tpu.memory_space<vmem>>, vector<8x1x32xf32>
    %564 = vector.shape_cast %563 : vector<8x1x32xf32> to vector<8x32xf32>
    %565 = vector.shape_cast %562 : vector<8x32xf32> to vector<8x1x32xf32>
    tpu.vector_store %arg13[%c0_187, %c0_188, %c0_189], %565 {strides = array<i32>} : memref<8x8x32xf32, #tpu.memory_space<vmem>>, vector<8x1x32xf32>,
    %566 = vector.extract_strided_slice %560 {offsets = [1, 0, 0], sizes = [1, 8, 32], strides = [1, 1, 1]} : vector<8x8x32xf32> to vector<1x8x32xf32>
    %567 = vector.shape_cast %566 : vector<1x8x32xf32> to vector<8x32xf32>
    %c0_190 = arith.constant 0 : index
    %c1 = arith.constant 1 : index
    %c0_191 = arith.constant 0 : index
    %568 = vector.load %arg13[%c0_190, %c1, %c0_191] : memref<8x8x32xf32, #tpu.memory_space<vmem>>, vector<8x1x32xf32>
    %569 = vector.shape_cast %568 : vector<8x1x32xf32> to vector<8x32xf32>
    %570 = vector.shape_cast %567 : vector<8x32xf32> to vector<8x1x32xf32>
    tpu.vector_store %arg13[%c0_190, %c1, %c0_191], %570 {strides = array<i32>} : memref<8x8x32xf32, #tpu.memory_space<vmem>>, vector<8x1x32xf32>,
    %571 = vector.extract_strided_slice %560 {offsets = [2, 0, 0], sizes = [1, 8, 32], strides = [1, 1, 1]} : vector<8x8x32xf32> to vector<1x8x32xf32>
    %572 = vector.shape_cast %571 : vector<1x8x32xf32> to vector<8x32xf32>
    %c0_192 = arith.constant 0 : index
    %c2 = arith.constant 2 : index
    %c0_193 = arith.constant 0 : index
    %573 = vector.load %arg13[%c0_192, %c2, %c0_193] : memref<8x8x32xf32, #tpu.memory_space<vmem>>, vector<8x1x32xf32>
    %574 = vector.shape_cast %573 : vector<8x1x32xf32> to vector<8x32xf32>
    %575 = vector.shape_cast %572 : vector<8x32xf32> to vector<8x1x32xf32>
    tpu.vector_store %arg13[%c0_192, %c2, %c0_193], %575 {strides = array<i32>} : memref<8x8x32xf32, #tpu.memory_space<vmem>>, vector<8x1x32xf32>,
    %576 = vector.extract_strided_slice %560 {offsets = [3, 0, 0], sizes = [1, 8, 32], strides = [1, 1, 1]} : vector<8x8x32xf32> to vector<1x8x32xf32>
    %577 = vector.shape_cast %576 : vector<1x8x32xf32> to vector<8x32xf32>
    %c0_194 = arith.constant 0 : index
    %c3 = arith.constant 3 : index
    %c0_195 = arith.constant 0 : index
    %578 = vector.load %arg13[%c0_194, %c3, %c0_195] : memref<8x8x32xf32, #tpu.memory_space<vmem>>, vector<8x1x32xf32>
    %579 = vector.shape_cast %578 : vector<8x1x32xf32> to vector<8x32xf32>
    %580 = vector.shape_cast %577 : vector<8x32xf32> to vector<8x1x32xf32>
    tpu.vector_store %arg13[%c0_194, %c3, %c0_195], %580 {strides = array<i32>} : memref<8x8x32xf32, #tpu.memory_space<vmem>>, vector<8x1x32xf32>,
    %581 = vector.extract_strided_slice %560 {offsets = [4, 0, 0], sizes = [1, 8, 32], strides = [1, 1, 1]} : vector<8x8x32xf32> to vector<1x8x32xf32>
    %582 = vector.shape_cast %581 : vector<1x8x32xf32> to vector<8x32xf32>
    %c0_196 = arith.constant 0 : index
    %c4 = arith.constant 4 : index
    %c0_197 = arith.constant 0 : index
    %583 = vector.load %arg13[%c0_196, %c4, %c0_197] : memref<8x8x32xf32, #tpu.memory_space<vmem>>, vector<8x1x32xf32>
    %584 = vector.shape_cast %583 : vector<8x1x32xf32> to vector<8x32xf32>
    %585 = vector.shape_cast %582 : vector<8x32xf32> to vector<8x1x32xf32>
    tpu.vector_store %arg13[%c0_196, %c4, %c0_197], %585 {strides = array<i32>} : memref<8x8x32xf32, #tpu.memory_space<vmem>>, vector<8x1x32xf32>,
    %586 = vector.extract_strided_slice %560 {offsets = [5, 0, 0], sizes = [1, 8, 32], strides = [1, 1, 1]} : vector<8x8x32xf32> to vector<1x8x32xf32>
    %587 = vector.shape_cast %586 : vector<1x8x32xf32> to vector<8x32xf32>
    %c0_198 = arith.constant 0 : index
    %c5 = arith.constant 5 : index
    %c0_199 = arith.constant 0 : index
    %588 = vector.load %arg13[%c0_198, %c5, %c0_199] : memref<8x8x32xf32, #tpu.memory_space<vmem>>, vector<8x1x32xf32>
    %589 = vector.shape_cast %588 : vector<8x1x32xf32> to vector<8x32xf32>
    %590 = vector.shape_cast %587 : vector<8x32xf32> to vector<8x1x32xf32>
    tpu.vector_store %arg13[%c0_198, %c5, %c0_199], %590 {strides = array<i32>} : memref<8x8x32xf32, #tpu.memory_space<vmem>>, vector<8x1x32xf32>,
    %591 = vector.extract_strided_slice %560 {offsets = [6, 0, 0], sizes = [1, 8, 32], strides = [1, 1, 1]} : vector<8x8x32xf32> to vector<1x8x32xf32>
    %592 = vector.shape_cast %591 : vector<1x8x32xf32> to vector<8x32xf32>
    %c0_200 = arith.constant 0 : index
    %c6 = arith.constant 6 : index
    %c0_201 = arith.constant 0 : index
    %593 = vector.load %arg13[%c0_200, %c6, %c0_201] : memref<8x8x32xf32, #tpu.memory_space<vmem>>, vector<8x1x32xf32>
    %594 = vector.shape_cast %593 : vector<8x1x32xf32> to vector<8x32xf32>
    %595 = vector.shape_cast %592 : vector<8x32xf32> to vector<8x1x32xf32>
    tpu.vector_store %arg13[%c0_200, %c6, %c0_201], %595 {strides = array<i32>} : memref<8x8x32xf32, #tpu.memory_space<vmem>>, vector<8x1x32xf32>,
    %596 = vector.extract_strided_slice %560 {offsets = [7, 0, 0], sizes = [1, 8, 32], strides = [1, 1, 1]} : vector<8x8x32xf32> to vector<1x8x32xf32>
    %597 = vector.shape_cast %596 : vector<1x8x32xf32> to vector<8x32xf32>
    %c0_202 = arith.constant 0 : index
    %c7 = arith.constant 7 : index
    %c0_203 = arith.constant 0 : index
    %598 = vector.load %arg13[%c0_202, %c7, %c0_203] : memref<8x8x32xf32, #tpu.memory_space<vmem>>, vector<8x1x32xf32>
    %599 = vector.shape_cast %598 : vector<8x1x32xf32> to vector<8x32xf32>
    %600 = vector.shape_cast %597 : vector<8x32xf32> to vector<8x1x32xf32>
    tpu.vector_store %arg13[%c0_202, %c7, %c0_203], %600 {strides = array<i32>} : memref<8x8x32xf32, #tpu.memory_space<vmem>>, vector<8x1x32xf32>,
    return
  }
  func.func @transform_0(%arg0: i32) -> (i32, i32, i32) {
    %c0_i32 = arith.constant 0 : i32
    %c0_i32_0 = arith.constant 0 : i32
    %c0_i32_1 = arith.constant 0 : i32
    return %c0_i32, %arg0, %c0_i32_0 : i32, i32, i32
  }
  func.func @transform_1(%arg0: i32) -> (i32, i32, i32) {
    %c0_i32 = arith.constant 0 : i32
    %c0_i32_0 = arith.constant 0 : i32
    %c0_i32_1 = arith.constant 0 : i32
    return %c0_i32, %arg0, %c0_i32_0 : i32, i32, i32
  }
  func.func @transform_2(%arg0: i32) -> (i32, i32) {
    %c0_i32 = arith.constant 0 : i32
    %c0_i32_0 = arith.constant 0 : i32
    %c0_i32_1 = arith.constant 0 : i32
    return %c0_i32, %c0_i32_0 : i32, i32
  }
  func.func @transform_3(%arg0: i32) -> (i32, i32) {
    %c0_i32 = arith.constant 0 : i32
    %c0_i32_0 = arith.constant 0 : i32
    %c0_i32_1 = arith.constant 0 : i32
    return %c0_i32, %c0_i32_0 : i32, i32
  }
  func.func @transform_4(%arg0: i32) -> (i32, i32) {
    %c0_i32 = arith.constant 0 : i32
    %c0_i32_0 = arith.constant 0 : i32
    %c0_i32_1 = arith.constant 0 : i32
    return %c0_i32, %c0_i32_0 : i32, i32
  }
  func.func @transform_5(%arg0: i32) -> (i32, i32) {
    %c0_i32 = arith.constant 0 : i32
    %c0_i32_0 = arith.constant 0 : i32
    %c0_i32_1 = arith.constant 0 : i32
    return %c0_i32, %c0_i32_0 : i32, i32
  }
  func.func @transform_6(%arg0: i32) -> (i32, i32) {
    %c0_i32 = arith.constant 0 : i32
    %c0_i32_0 = arith.constant 0 : i32
    %c0_i32_1 = arith.constant 0 : i32
    return %c0_i32, %c0_i32_0 : i32, i32
  }
  func.func @transform_7(%arg0: i32) -> (i32, i32) {
    %c0_i32 = arith.constant 0 : i32
    %c0_i32_0 = arith.constant 0 : i32
    %c0_i32_1 = arith.constant 0 : i32
    return %c0_i32, %c0_i32_0 : i32, i32
  }
  func.func @transform_8(%arg0: i32) -> (i32, i32) {
    %c0_i32 = arith.constant 0 : i32
    %c0_i32_0 = arith.constant 0 : i32
    %c0_i32_1 = arith.constant 0 : i32
    return %c0_i32, %c0_i32_0 : i32, i32
  }
  func.func @transform_9(%arg0: i32) -> (i32, i32) {
    %c0_i32 = arith.constant 0 : i32
    %c0_i32_0 = arith.constant 0 : i32
    %c0_i32_1 = arith.constant 0 : i32
    return %c0_i32, %c0_i32_0 : i32, i32
  }
  func.func @transform_10(%arg0: i32) -> (i32, i32) {
    %c0_i32 = arith.constant 0 : i32
    %c0_i32_0 = arith.constant 0 : i32
    %c0_i32_1 = arith.constant 0 : i32
    return %c0_i32, %c0_i32_0 : i32, i32
  }
  func.func @transform_11(%arg0: i32) -> (i32, i32) {
    %c0_i32 = arith.constant 0 : i32
    %c0_i32_0 = arith.constant 0 : i32
    %c0_i32_1 = arith.constant 0 : i32
    return %c0_i32, %c0_i32_0 : i32, i32
  }
  func.func @transform_12(%arg0: i32) -> (i32, i32, i32) {
    %c0_i32 = arith.constant 0 : i32
    %c0_i32_0 = arith.constant 0 : i32
    %c0_i32_1 = arith.constant 0 : i32
    return %arg0, %c0_i32, %c0_i32_0 : i32, i32, i32
  }
}

</mosaic_0001>

<bundles_post_ra>
// kernel: seq2seq_forward.1
= control target key start
LH: loop header
LB: loop body
LE: loop exit
PB: predicated region body
PF: predicated region fallthrough
CT: control target
= control target key end

     0   :  { %vm55_vm0 = vcmask 130048   ;;  %v1807_v14 = vmov 0.0   ;;  %vm134_vm5 = vcmask 261120   ;;  %s2457_s2 = inlined_call_operand.vmem [shape: f32[16,128], index: 2, kind: input, shape index: {}]   ;;  %s2458_s0 = inlined_call_operand.vmem [shape: f32[8,8,16], index: 0, kind: input, shape index: {}]   ;;  %s2459_s3 = inlined_call_operand.vmem [shape: f32[32,128], index: 3, kind: input, shape index: {}]   ;;  %s2460_s4 = inlined_call_operand.vmem [shape: f32[1,128], index: 4, kind: input, shape index: {}]   ;;  %s2461_s8 = inlined_call_operand.vmem [shape: f32[32,32], index: 8, kind: input, shape index: {}]   ;;  %s2462_s9 = inlined_call_operand.vmem [shape: f32[1,32], index: 9, kind: input, shape index: {}]   ;;  %s2463_s7 = inlined_call_operand.vmem [shape: f32[1,128], index: 7, kind: input, shape index: {}]   ;;  %s2464_s6 = inlined_call_operand.vmem [shape: f32[32,128], index: 6, kind: input, shape index: {}]   ;;  %s2465_s5 = inlined_call_operand.vmem [shape: f32[16,128], index: 5, kind: input, shape index: {}]   ;;  %s2466_s1 = inlined_call_operand.vmem [shape: f32[8,8,16], index: 1, kind: input, shape index: {}]   ;;  %s2467_s10 = inlined_call_operand.vmem [shape: f32[32,32], index: 10, kind: input, shape index: {}]   ;;  %s2468_s11 = inlined_call_operand.vmem [shape: f32[1,32], index: 11, kind: input, shape index: {}]   ;;  %s2469_s12 = inlined_call_operand.vmem [shape: f32[8,8,32], index: 12, kind: output, shape index: {}]  }
   0x1   :  { %v50_v0 = vld [vmem:[%s2457_s2 + $0x8] sm:$0xff]  ;;  %v49_v1 = vld [vmem:[%s2457_s2] sm:$0xff]  ;;  %v133_v3 = vld [vmem:[%s2459_s3 + $0x18] sm:$0xff] }
   0x2   :  { %94 = vmatpush.msra.mxu0 %v50_v0  ;;  %v41_v2 = vld [vmem:[%s2458_s0] sm:$0xff]  ;;  %345 = vmatpush.msra.mxu1 %v133_v3  ;;  %v132_v4 = vld [vmem:[%s2459_s3 + $0x10] sm:$0xff]  ;;  %v131_v5 = vld [vmem:[%s2459_s3 + $0x8] sm:$0xff] }
   0x3   :  { %410 = vmatpush.msra.mxu2 %v133_v3  ;;  %475 = vmatpush.msra.mxu3 %v133_v3  ;;  %v42_v6 = vld [vmem:[%s2458_s0 + $0x8] sm:$0xff]  ;;  %v43_v7 = vld [vmem:[%s2458_s0 + $0x10] sm:$0xff]  ;;  %v130_v8 = vld [vmem:[%s2459_s3] sm:$0xff] }
   0x4   :  { %95 = vmatpush.msra.mxu0 %v49_v1  ;;  %346 = vmatpush.msra.mxu1 %v132_v4  ;;  %v44_v9 = vld [vmem:[%s2458_s0 + $0x18] sm:$0xff]  ;;  %v45_v10 = vld [vmem:[%s2458_s0 + $0x20] sm:$0xff]  ;;  %v46_v11 = vld [vmem:[%s2458_s0 + $0x28] sm:$0xff] }
   0x5   :  { %1610 = vmatmul.msk.f32.vlgmr.msra.gmra.mxu0 %vm55_vm0, %v41_v2  ;;  %411 = vmatpush.msra.mxu2 %v132_v4  ;;  %v47_v12 = vld [vmem:[%s2458_s0 + $0x30] sm:$0xff]  ;;  %v48_v13 = vld [vmem:[%s2458_s0 + $0x38] sm:$0xff]  ;;  %v1673_v16 = vld [vmem:[%s2460_s4] ss:$0 sm:$0xff]  ;;  %s1808_s0 = smov 64   ;;  %s1809_s4 = smov 32  }
   0x6   :  { %150 = vmatpush.msrb.mxu0 %v133_v3  ;;  %347 = vmatpush.msra.mxu1 %v131_v5 }
   0x7   :  { %476 = vmatpush.msra.mxu3 %v132_v4  ;;  %412 = vmatpush.msra.mxu2 %v131_v5 }
   0x8   :  { %151 = vmatpush.msrb.mxu0 %v132_v4  ;;  %348 = vmatpush.msra.mxu1 %v130_v8 }
   0x9   :  { %477 = vmatpush.msra.mxu3 %v131_v5  ;;  %413 = vmatpush.msra.mxu2 %v130_v8 }
   0xa   :  { %152 = vmatpush.msrb.mxu0 %v131_v5  ;;  %540 = vmatpush.msrb.mxu1 %v133_v3 }
   0xb   :  { %478 = vmatpush.msra.mxu3 %v130_v8  ;;  %605 = vmatpush.msrb.mxu2 %v133_v3 }
   0xc   :  { %153 = vmatpush.msrb.mxu0 %v130_v8  ;;  %541 = vmatpush.msrb.mxu1 %v132_v4 }
   0xd   :  { %1611 = vmatmul.msk.f32.gmra.mxu0 %vm55_vm0, %v42_v6  ;;  %606 = vmatpush.msrb.mxu2 %v132_v4 }
   0xe   :  { %215 = vmatpush.msra.mxu0 %v133_v3  ;;  %542 = vmatpush.msrb.mxu1 %v131_v5 }
   0xf   :  { %607 = vmatpush.msrb.mxu2 %v131_v5 }
  0x10   :  { %216 = vmatpush.msra.mxu0 %v132_v4  ;;  %543 = vmatpush.msrb.mxu1 %v130_v8 }
  0x11   :  { %608 = vmatpush.msrb.mxu2 %v130_v8 }
  0x12   :  { %217 = vmatpush.msra.mxu0 %v131_v5 }
  0x14   :  { %218 = vmatpush.msra.mxu0 %v130_v8 }
  0x15   :  { %1612 = vmatmul.msk.f32.gmra.mxu0 %vm55_vm0, %v43_v7 }
  0x1d   :  { %1613 = vmatmul.msk.f32.gmra.mxu0 %vm55_vm0, %v44_v9 }
  0x25   :  { %1614 = vmatmul.msk.f32.gmra.mxu0 %vm55_vm0, %v45_v10 }
  0x2d   :  { %1615 = vmatmul.msk.f32.gmra.mxu0 %vm55_vm0, %v46_v11 }
  0x35   :  { %1616 = vmatmul.msk.f32.gmra.mxu0 %vm55_vm0, %v47_v12 }
  0x3d   :  { %1617 = vmatmul.msk.f32.gmra.mxu0 %vm55_vm0, %v48_v13 }
  0x45   :  { %154 = vmatmul.f32.vlgmr.msrb.gmra.mxu0 %v1807_v14 }
  0x46   :  { %280 = vmatpush.msrb.mxu0 %v133_v3 }
  0x48   :  { %281 = vmatpush.msrb.mxu0 %v132_v4 }
  0x4a   :  { %282 = vmatpush.msrb.mxu0 %v131_v5 }
  0x4c   :  { %283 = vmatpush.msrb.mxu0 %v130_v8 }
  0x82   :  { %v97_v15 = vpop.f32.mrf.mxu0 }
  0x83   :  { %v98_v31 = vadd.f32 %v1673_v16, %v97_v15 }
  0x8a   :  { %v100_v17 = vpop.f32.mrf.mxu0 }
  0x8b   :  { %v101_v18 = vadd.f32 %v1673_v16, %v100_v17 }
  0x92   :  { %v103_v19 = vpop.f32.mrf.mxu0 }
  0x93   :  { %v1928_v20 = vadd.f32 %v1673_v16, %v103_v19 }
  0x9a   :  { %v106_v21 = vpop.f32.mrf.mxu0 }
  0x9b   :  { %v1930_v22 = vadd.f32 %v1673_v16, %v106_v21 }
  0xa2   :  { %v109_v23 = vpop.f32.mrf.mxu0 }
  0xa3   :  { %v1932_v24 = vadd.f32 %v1673_v16, %v109_v23 }
  0xaa   :  { %v112_v25 = vpop.f32.mrf.mxu0 }
  0xab   :  { %v1934_v26 = vadd.f32 %v1673_v16, %v112_v25 }
  0xb2   :  { %v115_v27 = vpop.f32.mrf.mxu0 }
  0xb3   :  { %v1936_v28 = vadd.f32 %v1673_v16, %v115_v27 }
  0xba   :  { %v118_v29 = vpop.f32.mrf.mxu0 }
  0xbb   :  { %v1938_v30 = vadd.f32 %v1673_v16, %v118_v29 }
  0xc2   :  { %v155_v32 = vpop.f32.mrf.mxu0 }
  0xc3   :  { %v158_v33 = vadd.f32 %v155_v32, %v98_v31 }
  0xc5   :  { %1677 = vtanh.f32 %v158_v33  ;;  %v1618_v35 = vmul.f32 -1.442695, %v158_v33 }
  0xc7   :  { %1679 = vpow2.f32 %v1618_v35 }
  0xcb   :  { %v1678_v34 = vpop.eup %1677 }
  0xcc   :  { %181 = vrot.lane.b32.xlu0 %v1678_v34, %s1808_s0 }
  0xcd   :  { %v1680_v36 = vpop.eup %1679 }
  0xce   :  { %v162_v37 = vadd.f32 1.0, %v1680_v36 }
  0xd0   :  { %1681 = vrcp.f32 %v162_v37  ;;  %v174_v43 = vand.u32 2147483648, %v162_v37  ;;  %vm168_vm2 = vweird.f32 %v162_v37  ;;  %v172_v44 = vand.u32 2147483647, %v162_v37 }
  0xd2   :  { %v175_v46 = vor.u32 1.1754944e-38, %v174_v43  ;;  %vm173_vm4 = vcmp.eq.f32.partialorder %v172_v44, 8.507059e+37 }
  0xd6   :  { %v1682_v38 = vpop.eup %1681 }
  0xd7   :  { %v164_v39 = vmul.f32 %v1682_v38, %v162_v37  ;;  %vm169_vm1 = vweird.f32 %v1682_v38 }
  0xd8   :  { %vm170_vm3 = vmor %vm168_vm2, %vm169_vm1 }
  0xd9   :  { %v165_v40 = vsub.f32 1.0, %v164_v39 }
  0xdb   :  { %v166_v41 = vmul.f32 %v1682_v38, %v165_v40 }
  0xdd   :  { %v167_v42 = vadd.f32 %v1682_v38, %v166_v41 }
  0xdf   :  { %v171_v45 = vsel %vm170_vm3, %v1682_v38, %v167_v42 }
  0xe0   :  { %v176_v48 = vsel %vm173_vm4, %v175_v46, %v171_v45 }
  0xe1   :  { %v179_v50 = vmul.f32 0.0, %v176_v48 }
 0x13e   :  { %v182_v47 = vpop.permute.xlu0 %181 }
 0x13f   :  { %v184_v49 = vmul.f32 %v182_v47, %v176_v48 }
 0x141   :  { %186 = vrot.lane.b32.xlu0 %v184_v49, %s1809_s4 }
 0x1b3   :  { %v187_v51 = vpop.permute.xlu0 %186 }
 0x1b4   :  { %v189_v52 = vadd.f32 %v187_v51, %v179_v50 }
 0x1b6   :  { %1683 = vtanh.f32 %v189_v52 }
 0x1bc   :  { %v1684_v53 = vpop.eup %1683 }
 0x1bd   :  { %192 = vrot.lane.b32.xlu1 %v1684_v53, %s1808_s0 }
 0x22f   :  { %v193_v54 = vpop.permute.xlu1 %192 }
 0x230   :  { %v195_v55 = vmul.f32 %v193_v54, %v176_v48 }
 0x232   :  { %199 = vrot.lane.b32.xlu1 %v195_v55, %s1809_s4 }
 0x2a4   :  { %v200_v56 = vpop.permute.xlu1 %199 }
 0x2a5   :  { %1619 = vmatmul.msk.f32.vlgmr.msra.gmra.mxu0 %vm134_vm5, %v200_v56 }
 0x322   :  { %v220_v57 = vpop.f32.mrf.mxu0 }
 0x323   :  { %v223_v58 = vadd.f32 %v220_v57, %v101_v18 }
 0x325   :  { %1685 = vtanh.f32 %v223_v58  ;;  %v1620_v60 = vmul.f32 -1.442695, %v223_v58 }
 0x327   :  { %1687 = vpow2.f32 %v1620_v60 }
 0x32b   :  { %v1686_v59 = vpop.eup %1685 }
 0x32c   :  { %246 = vrot.lane.b32.xlu2 %v1686_v59, %s1808_s0 }
 0x32d   :  { %v1688_v61 = vpop.eup %1687 }
 0x32e   :  { %v227_v62 = vadd.f32 1.0, %v1688_v61 }
 0x330   :  { %1689 = vrcp.f32 %v227_v62  ;;  %v239_v4 = vand.u32 2147483648, %v227_v62  ;;  %vm233_vm7 = vweird.f32 %v227_v62  ;;  %v237_v5 = vand.u32 2147483647, %v227_v62 }
 0x332   :  { %v240_v7 = vor.u32 1.1754944e-38, %v239_v4  ;;  %vm238_vm9 = vcmp.eq.f32.partialorder %v237_v5, 8.507059e+37 }
 0x336   :  { %v1690_v63 = vpop.eup %1689 }
 0x337   :  { %v229_v0 = vmul.f32 %v1690_v63, %v227_v62  ;;  %vm234_vm6 = vweird.f32 %v1690_v63 }
 0x338   :  { %vm235_vm8 = vmor %vm233_vm7, %vm234_vm6 }
 0x339   :  { %v230_v1 = vsub.f32 1.0, %v229_v0 }
 0x33b   :  { %v231_v2 = vmul.f32 %v1690_v63, %v230_v1 }
 0x33d   :  { %v232_v3 = vadd.f32 %v1690_v63, %v231_v2 }
 0x33f   :  { %v236_v6 = vsel %vm235_vm8, %v1690_v63, %v232_v3 }
 0x340   :  { %v241_v9 = vsel %vm238_vm9, %v240_v7, %v236_v6 }
 0x341   :  { %v244_v11 = vmul.f32 %v241_v9, %v189_v52 }
 0x386   :  { %v247_v8 = vpop.permute.xlu2 %246 }
 0x387   :  { %v249_v10 = vmul.f32 %v247_v8, %v241_v9 }
 0x389   :  { %251 = vrot.lane.b32.xlu2 %v249_v10, %s1809_s4 }
 0x3e3   :  { %v252_v12 = vpop.permute.xlu2 %251 }
 0x3e4   :  { %v254_v13 = vadd.f32 %v252_v12, %v244_v11 }
 0x3e6   :  { %1691 = vtanh.f32 %v254_v13 }
 0x3ec   :  { %v1692_v14 = vpop.eup %1691 }
 0x3ed   :  { %257 = vrot.lane.b32.xlu0 %v1692_v14, %s1808_s0 }
 0x45f   :  { %v258_v15 = vpop.permute.xlu0 %257 }
 0x460   :  { %v260_v16 = vmul.f32 %v258_v15, %v241_v9 }
 0x462   :  { %264 = vrot.lane.b32.xlu1 %v260_v16, %s1809_s4 }
 0x4d4   :  { %v265_v17 = vpop.permute.xlu1 %264 }
 0x4d5   :  { %1621 = vmatmul.msk.f32.vlgmr.msrb.gmra.mxu0 %vm134_vm5, %v265_v17 }
 0x552   :  { %v285_v18 = vpop.f32.mrf.mxu0 }
 0x553   :  { %v288_v19 = vadd.f32 %v285_v18, %v1928_v20 }
 0x555   :  { %1693 = vtanh.f32 %v288_v19  ;;  %v1622_v23 = vmul.f32 -1.442695, %v288_v19 }
 0x557   :  { %1695 = vpow2.f32 %v1622_v23 }
 0x55b   :  { %v1694_v21 = vpop.eup %1693 }
 0x55c   :  { %311 = vrot.lane.b32.xlu2 %v1694_v21, %s1808_s0 }
 0x55d   :  { %v1696_v25 = vpop.eup %1695 }
 0x55e   :  { %v292_v27 = vadd.f32 1.0, %v1696_v25 }
 0x560   :  { %1697 = vrcp.f32 %v292_v27  ;;  %v304_v35 = vand.u32 2147483648, %v292_v27  ;;  %vm298_vm11 = vweird.f32 %v292_v27  ;;  %v302_v36 = vand.u32 2147483647, %v292_v27 }
 0x562   :  { %v305_v37 = vor.u32 1.1754944e-38, %v304_v35  ;;  %vm303_vm13 = vcmp.eq.f32.partialorder %v302_v36, 8.507059e+37 }
 0x566   :  { %v1698_v29 = vpop.eup %1697 }
 0x567   :  { %v294_v31 = vmul.f32 %v1698_v29, %v292_v27  ;;  %vm299_vm10 = vweird.f32 %v1698_v29 }
 0x568   :  { %vm300_vm12 = vmor %vm298_vm11, %vm299_vm10 }
 0x569   :  { %v295_v32 = vsub.f32 1.0, %v294_v31 }
 0x56b   :  { %v296_v33 = vmul.f32 %v1698_v29, %v295_v32 }
 0x56d   :  { %v297_v34 = vadd.f32 %v1698_v29, %v296_v33 }
 0x56f   :  { %v301_v20 = vsel %vm300_vm12, %v1698_v29, %v297_v34 }
 0x570   :  { %v306_v39 = vsel %vm303_vm13, %v305_v37, %v301_v20 }
 0x571   :  { %v309_v41 = vmul.f32 %v306_v39, %v254_v13 }
 0x5b6   :  { %v312_v38 = vpop.permute.xlu2 %311 }
 0x5b7   :  { %v314_v40 = vmul.f32 %v312_v38, %v306_v39 }
 0x5b9   :  { %316 = vrot.lane.b32.xlu0 %v314_v40, %s1809_s4 }
 0x62b   :  { %v317_v42 = vpop.permute.xlu0 %316 }
 0x62c   :  { %v319_v43 = vadd.f32 %v317_v42, %v309_v41 }
 0x62e   :  { %1699 = vtanh.f32 %v319_v43 }
 0x634   :  { %v1700_v44 = vpop.eup %1699 }
 0x635   :  { %322 = vrot.lane.b32.xlu1 %v1700_v44, %s1808_s0 }
 0x6a7   :  { %v323_v45 = vpop.permute.xlu1 %322 }
 0x6a8   :  { %v325_v46 = vmul.f32 %v323_v45, %v306_v39 }
 0x6aa   :  { %329 = vrot.lane.b32.xlu2 %v325_v46, %s1809_s4 }
 0x704   :  { %v330_v47 = vpop.permute.xlu2 %329 }
 0x705   :  { %1623 = vmatmul.msk.f32.vlgmr.msra.gmra.mxu1 %vm134_vm5, %v330_v47 }
 0x782   :  { %v350_v48 = vpop.f32.mrf.mxu1 }
 0x783   :  { %v353_v49 = vadd.f32 %v350_v48, %v1930_v22 }
 0x785   :  { %1701 = vtanh.f32 %v353_v49  ;;  %v1624_v51 = vmul.f32 -1.442695, %v353_v49 }
 0x787   :  { %1703 = vpow2.f32 %v1624_v51 }
 0x78b   :  { %v1702_v50 = vpop.eup %1701 }
 0x78c   :  { %376 = vrot.lane.b32.xlu0 %v1702_v50, %s1808_s0 }
 0x78d   :  { %v1704_v52 = vpop.eup %1703 }
 0x78e   :  { %v357_v53 = vadd.f32 1.0, %v1704_v52 }
 0x790   :  { %1705 = vrcp.f32 %v357_v53  ;;  %v369_v59 = vand.u32 2147483648, %v357_v53  ;;  %vm363_vm15 = vweird.f32 %v357_v53  ;;  %v367_v60 = vand.u32 2147483647, %v357_v53 }
 0x792   :  { %v370_v61 = vor.u32 1.1754944e-38, %v369_v59  ;;  %vm368_vm2 = vcmp.eq.f32.partialorder %v367_v60, 8.507059e+37 }
 0x796   :  { %v1706_v54 = vpop.eup %1705 }
 0x797   :  { %v359_v55 = vmul.f32 %v1706_v54, %v357_v53  ;;  %vm364_vm14 = vweird.f32 %v1706_v54 }
 0x798   :  { %vm365_vm1 = vmor %vm363_vm15, %vm364_vm14 }
 0x799   :  { %v360_v56 = vsub.f32 1.0, %v359_v55 }
 0x79b   :  { %v361_v57 = vmul.f32 %v1706_v54, %v360_v56 }
 0x79d   :  { %v362_v58 = vadd.f32 %v1706_v54, %v361_v57 }
 0x79f   :  { %v366_v22 = vsel %vm365_vm1, %v1706_v54, %v362_v58 }
 0x7a0   :  { %v371_v63 = vsel %vm368_vm2, %v370_v61, %v366_v22 }
 0x7a1   :  { %v374_v1 = vmul.f32 %v371_v63, %v319_v43 }
 0x7fe   :  { %v377_v62 = vpop.permute.xlu0 %376 }
 0x7ff   :  { %v379_v0 = vmul.f32 %v377_v62, %v371_v63 }
 0x801   :  { %381 = vrot.lane.b32.xlu1 %v379_v0, %s1809_s4 }
 0x873   :  { %v382_v2 = vpop.permute.xlu1 %381 }
 0x874   :  { %v384_v3 = vadd.f32 %v382_v2, %v374_v1 }
 0x876   :  { %1707 = vtanh.f32 %v384_v3 }
 0x87c   :  { %v1708_v4 = vpop.eup %1707 }
 0x87d   :  { %387 = vrot.lane.b32.xlu2 %v1708_v4, %s1808_s0 }
 0x8d7   :  { %v388_v5 = vpop.permute.xlu2 %387 }
 0x8d8   :  { %v390_v6 = vmul.f32 %v388_v5, %v371_v63 }
 0x8da   :  { %394 = vrot.lane.b32.xlu0 %v390_v6, %s1809_s4 }
 0x94c   :  { %v395_v7 = vpop.permute.xlu0 %394 }
 0x94d   :  { %1625 = vmatmul.msk.f32.vlgmr.msra.gmra.mxu2 %vm134_vm5, %v395_v7 }
 0x9d0   :  { %v415_v8 = vpop.f32.mrf.mxu2 }
 0x9d1   :  { %v418_v9 = vadd.f32 %v415_v8, %v1932_v24 }
 0x9d3   :  { %1709 = vtanh.f32 %v418_v9  ;;  %v1626_v11 = vmul.f32 -1.442695, %v418_v9 }
 0x9d5   :  { %1711 = vpow2.f32 %v1626_v11 }
 0x9d9   :  { %v1710_v10 = vpop.eup %1709 }
 0x9da   :  { %441 = vrot.lane.b32.xlu1 %v1710_v10, %s1808_s0 }
 0x9db   :  { %v1712_v12 = vpop.eup %1711 }
 0x9dc   :  { %v422_v13 = vadd.f32 1.0, %v1712_v12 }
 0x9de   :  { %1713 = vrcp.f32 %v422_v13  ;;  %v434_v19 = vand.u32 2147483648, %v422_v13  ;;  %vm428_vm4 = vweird.f32 %v422_v13  ;;  %v432_v21 = vand.u32 2147483647, %v422_v13 }
 0x9e0   :  { %v435_v23 = vor.u32 1.1754944e-38, %v434_v19  ;;  %vm433_vm7 = vcmp.eq.f32.partialorder %v432_v21, 8.507059e+37 }
 0x9e4   :  { %v1714_v14 = vpop.eup %1713 }
 0x9e5   :  { %v424_v15 = vmul.f32 %v1714_v14, %v422_v13  ;;  %vm429_vm3 = vweird.f32 %v1714_v14 }
 0x9e6   :  { %vm430_vm6 = vmor %vm428_vm4, %vm429_vm3 }
 0x9e7   :  { %v425_v16 = vsub.f32 1.0, %v424_v15 }
 0x9e9   :  { %v426_v17 = vmul.f32 %v1714_v14, %v425_v16 }
 0x9eb   :  { %v427_v18 = vadd.f32 %v1714_v14, %v426_v17 }
 0x9ed   :  { %v431_v24 = vsel %vm430_vm6, %v1714_v14, %v427_v18 }
 0x9ee   :  { %v436_v27 = vsel %vm433_vm7, %v435_v23, %v431_v24 }
 0x9ef   :  { %v439_v31 = vmul.f32 %v436_v27, %v384_v3 }
 0xa4c   :  { %v442_v25 = vpop.permute.xlu1 %441 }
 0xa4d   :  { %v444_v29 = vmul.f32 %v442_v25, %v436_v27 }
 0xa4f   :  { %446 = vrot.lane.b32.xlu2 %v444_v29, %s1809_s4 }
 0xaa9   :  { %v447_v32 = vpop.permute.xlu2 %446 }
 0xaaa   :  { %v449_v33 = vadd.f32 %v447_v32, %v439_v31 }
 0xaac   :  { %1715 = vtanh.f32 %v449_v33 }
 0xab2   :  { %v1716_v34 = vpop.eup %1715 }
 0xab3   :  { %452 = vrot.lane.b32.xlu0 %v1716_v34, %s1808_s0 }
 0xb25   :  { %v453_v35 = vpop.permute.xlu0 %452 }
 0xb26   :  { %v455_v36 = vmul.f32 %v453_v35, %v436_v27 }
 0xb28   :  { %459 = vrot.lane.b32.xlu1 %v455_v36, %s1809_s4 }
 0xb9a   :  { %v460_v20 = vpop.permute.xlu1 %459 }
 0xb9b   :  { %1627 = vmatmul.msk.f32.vlgmr.msra.gmra.mxu3 %vm134_vm5, %v460_v20 }
 0xc1e   :  { %v480_v37 = vpop.f32.mrf.mxu3 }
 0xc1f   :  { %v483_v38 = vadd.f32 %v480_v37, %v1934_v26 }
 0xc21   :  { %1717 = vtanh.f32 %v483_v38  ;;  %v1628_v40 = vmul.f32 -1.442695, %v483_v38 }
 0xc23   :  { %1719 = vpow2.f32 %v1628_v40 }
 0xc27   :  { %v1718_v39 = vpop.eup %1717 }
 0xc28   :  { %506 = vrot.lane.b32.xlu2 %v1718_v39, %s1808_s0 }
 0xc29   :  { %v1720_v41 = vpop.eup %1719 }
 0xc2a   :  { %v487_v42 = vadd.f32 1.0, %v1720_v41 }
 0xc2c   :  { %1721 = vrcp.f32 %v487_v42  ;;  %v499_v48 = vand.u32 2147483648, %v487_v42  ;;  %vm493_vm9 = vweird.f32 %v487_v42  ;;  %v497_v49 = vand.u32 2147483647, %v487_v42 }
 0xc2e   :  { %v500_v50 = vor.u32 1.1754944e-38, %v499_v48  ;;  %vm498_vm11 = vcmp.eq.f32.partialorder %v497_v49, 8.507059e+37  ;;  %v651_v48 = vld [vmem:[%s2461_s8] sm:$0xff] }
 0xc32   :  { %v1722_v43 = vpop.eup %1721 }
 0xc33   :  { %v489_v44 = vmul.f32 %v1722_v43, %v487_v42  ;;  %vm494_vm8 = vweird.f32 %v1722_v43 }
 0xc34   :  { %vm495_vm10 = vmor %vm493_vm9, %vm494_vm8 }
 0xc35   :  { %v490_v45 = vsub.f32 1.0, %v489_v44 }
 0xc37   :  { %v491_v46 = vmul.f32 %v1722_v43, %v490_v45  ;;  %v654_v45 = vld [vmem:[%s2461_s8 + $0x18] sm:$0xff] }
 0xc38   :  { %676 = vmatpush.msrb.mxu3 %v654_v45 }
 0xc39   :  { %v492_v47 = vadd.f32 %v1722_v43, %v491_v46  ;;  %v653_v46 = vld [vmem:[%s2461_s8 + $0x10] sm:$0xff] }
 0xc3a   :  { %677 = vmatpush.msrb.mxu3 %v653_v46 }
 0xc3b   :  { %v496_v26 = vsel %vm495_vm10, %v1722_v43, %v492_v47  ;;  %v652_v47 = vld [vmem:[%s2461_s8 + $0x8] sm:$0xff] }
 0xc3c   :  { %v501_v52 = vsel %vm498_vm11, %v500_v50, %v496_v26  ;;  %678 = vmatpush.msrb.mxu3 %v652_v47 }
 0xc3d   :  { %v504_v54 = vmul.f32 %v501_v52, %v449_v33 }
 0xc3e   :  { %679 = vmatpush.msrb.mxu3 %v651_v48 }
 0xc82   :  { %v507_v51 = vpop.permute.xlu2 %506 }
 0xc83   :  { %v509_v53 = vmul.f32 %v507_v51, %v501_v52  ;;  %v2004_v51 = vld [vmem:[%s2464_s6 + $0x18] sm:$0xff] }
 0xc84   :  { %792 = vmatpush.msra.mxu2 %v2004_v51  ;;  %862 = vmatpush.msra.mxu3 %v2004_v51 }
 0xc85   :  { %511 = vrot.lane.b32.xlu0 %v509_v53, %s1809_s4  ;;  %v694_v53 = vld [vmem:[%s2465_s5 + $0x8] sm:$0xff] }
 0xc86   :  { %737 = vmatpush.msra.mxu1 %v694_v53 }
 0xcf7   :  { %v512_v55 = vpop.permute.xlu0 %511 }
 0xcf8   :  { %v514_v56 = vadd.f32 %v512_v55, %v504_v54  ;;  %v2019_v54 = vld [vmem:[%s2464_s6 + $0x8] sm:$0xff]  ;;  %v693_v55 = vld [vmem:[%s2465_s5] sm:$0xff] }
 0xcf9   :  { %738 = vmatpush.msra.mxu1 %v693_v55 }
 0xcfa   :  { %1723 = vtanh.f32 %v514_v56 }
 0xd00   :  { %v1724_v57 = vpop.eup %1723 }
 0xd01   :  { %517 = vrot.lane.b32.xlu1 %v1724_v57, %s1808_s0  ;;  %v685_v57 = vld [vmem:[%s2466_s1] sm:$0xff] }
 0xd73   :  { %v518_v58 = vpop.permute.xlu1 %517 }
 0xd74   :  { %v520_v59 = vmul.f32 %v518_v58, %v501_v52  ;;  %v2010_v52 = vld [vmem:[%s2464_s6 + $0x10] sm:$0xff]  ;;  %v1674_v58 = vld [vmem:[%s2462_s9] ss:$0 sm:$0xff] }
 0xd75   :  { %793 = vmatpush.msra.mxu2 %v2010_v52  ;;  %863 = vmatpush.msra.mxu3 %v2010_v52 }
 0xd76   :  { %524 = vrot.lane.b32.xlu2 %v520_v59, %s1809_s4 }
 0xd77   :  { %794 = vmatpush.msra.mxu2 %v2019_v54  ;;  %864 = vmatpush.msra.mxu3 %v2019_v54 }
 0xdd0   :  { %v525_v60 = vpop.permute.xlu2 %524 }
 0xdd1   :  { %1629 = vmatmul.msk.f32.vlgmr.msrb.gmra.mxu1 %vm134_vm5, %v525_v60 }
 0xdd9   :  { %1634 = vmatmul.msk.f32.vlgmr.msra.gmra.mxu1 %vm55_vm0, %v685_v57  ;;  %v687_v57 = vld [vmem:[%s2466_s1 + $0x10] sm:$0xff] }
 0xe4e   :  { %v545_v22 = vpop.f32.mrf.mxu1 }
 0xe4f   :  { %v548_v61 = vadd.f32 %v545_v22, %v1936_v28 }
 0xe51   :  { %1725 = vtanh.f32 %v548_v61  ;;  %v1630_v63 = vmul.f32 -1.442695, %v548_v61  ;;  %v2058_v61 = vld [vmem:[%s2463_s7] ss:$0 sm:$0xff] }
 0xe53   :  { %1727 = vpow2.f32 %v1630_v63 }
 0xe57   :  { %v1726_v62 = vpop.eup %1725 }
 0xe58   :  { %571 = vrot.lane.b32.xlu0 %v1726_v62, %s1808_s0  ;;  %v740_v62 = vpop.f32.mrf.mxu1 }
 0xe59   :  { %v1728_v0 = vpop.eup %1727  ;;  %v741_v63 = vadd.f32 %v2058_v61, %v740_v62 }
 0xe5a   :  { %v552_v1 = vadd.f32 1.0, %v1728_v0 }
 0xe5c   :  { %1729 = vrcp.f32 %v552_v1  ;;  %v564_v7 = vand.u32 2147483648, %v552_v1  ;;  %vm558_vm13 = vweird.f32 %v552_v1  ;;  %v562_v8 = vand.u32 2147483647, %v552_v1 }
 0xe5e   :  { %v565_v9 = vor.u32 1.1754944e-38, %v564_v7  ;;  %vm563_vm15 = vcmp.eq.f32.partialorder %v562_v8, 8.507059e+37 }
 0xe62   :  { %v1730_v2 = vpop.eup %1729 }
 0xe63   :  { %v554_v3 = vmul.f32 %v1730_v2, %v552_v1  ;;  %vm559_vm12 = vweird.f32 %v1730_v2 }
 0xe64   :  { %vm560_vm14 = vmor %vm558_vm13, %vm559_vm12 }
 0xe65   :  { %v555_v4 = vsub.f32 1.0, %v554_v3 }
 0xe67   :  { %v556_v5 = vmul.f32 %v1730_v2, %v555_v4 }
 0xe69   :  { %v557_v6 = vadd.f32 %v1730_v2, %v556_v5 }
 0xe6b   :  { %v561_v28 = vsel %vm560_vm14, %v1730_v2, %v557_v6 }
 0xe6c   :  { %v566_v11 = vsel %vm563_vm15, %v565_v9, %v561_v28 }
 0xe6d   :  { %v569_v13 = vmul.f32 %v566_v11, %v514_v56  ;;  %v2029_v56 = vld [vmem:[%s2464_s6] sm:$0xff] }
 0xe6e   :  { %795 = vmatpush.msra.mxu2 %v2029_v56  ;;  %865 = vmatpush.msra.mxu3 %v2029_v56 }
 0xeca   :  { %v572_v10 = vpop.permute.xlu0 %571 }
 0xecb   :  { %v574_v12 = vmul.f32 %v572_v10, %v566_v11 }
 0xecd   :  { %576 = vrot.lane.b32.xlu1 %v574_v12, %s1809_s4 }
 0xf3f   :  { %v577_v14 = vpop.permute.xlu1 %576 }
 0xf40   :  { %v579_v15 = vadd.f32 %v577_v14, %v569_v13 }
 0xf42   :  { %1731 = vtanh.f32 %v579_v15 }
 0xf48   :  { %v1732_v16 = vpop.eup %1731 }
 0xf49   :  { %582 = vrot.lane.b32.xlu2 %v1732_v16, %s1808_s0 }
 0xfa3   :  { %v583_v17 = vpop.permute.xlu2 %582 }
 0xfa4   :  { %v585_v18 = vmul.f32 %v583_v17, %v566_v11 }
 0xfa6   :  { %589 = vrot.lane.b32.xlu0 %v585_v18, %s1809_s4 }
0x1018   :  { %v590_v19 = vpop.permute.xlu0 %589 }
0x1019   :  { %1631 = vmatmul.msk.f32.vlgmr.msrb.gmra.mxu2 %vm134_vm5, %v590_v19 }
0x101a   :  { %933 = vmatpush.msrb.mxu2 %v2004_v51 }
0x101c   :  { %934 = vmatpush.msrb.mxu2 %v2010_v52 }
0x101e   :  { %935 = vmatpush.msrb.mxu2 %v2019_v54 }
0x1020   :  { %936 = vmatpush.msrb.mxu2 %v2029_v56 }
0x109c   :  { %v610_v21 = vpop.f32.mrf.mxu2 }
0x109d   :  { %v613_v24 = vadd.f32 %v610_v21, %v1938_v30 }
0x109f   :  { %1733 = vtanh.f32 %v613_v24  ;;  %v1632_v25 = vmul.f32 -1.442695, %v613_v24 }
0x10a1   :  { %1735 = vpow2.f32 %v1632_v25  ;;  %v686_v25 = vld [vmem:[%s2466_s1 + $0x8] sm:$0xff] }
0x10a2   :  { %1635 = vmatmul.msk.f32.gmra.mxu1 %vm55_vm0, %v686_v25 }
0x10a5   :  { %v1734_v23 = vpop.eup %1733 }
0x10a6   :  { %636 = vrot.lane.b32.xlu1 %v1734_v23, %s1808_s0 }
0x10a7   :  { %v1736_v27 = vpop.eup %1735 }
0x10a8   :  { %v617_v29 = vadd.f32 1.0, %v1736_v27 }
0x10aa   :  { %1737 = vrcp.f32 %v617_v29  ;;  %v629_v36 = vand.u32 2147483648, %v617_v29  ;;  %vm623_vm2 = vweird.f32 %v617_v29  ;;  %v627_v20 = vand.u32 2147483647, %v617_v29  ;;  %1636 = vmatmul.msk.f32.gmra.mxu1 %vm55_vm0, %v687_v57 }
0x10ac   :  { %v630_v37 = vor.u32 1.1754944e-38, %v629_v36  ;;  %vm628_vm4 = vcmp.eq.f32.partialorder %v627_v20, 8.507059e+37 }
0x10b0   :  { %v1738_v31 = vpop.eup %1737 }
0x10b1   :  { %v619_v32 = vmul.f32 %v1738_v31, %v617_v29  ;;  %vm624_vm1 = vweird.f32 %v1738_v31 }
0x10b2   :  { %vm625_vm3 = vmor %vm623_vm2, %vm624_vm1 }
0x10b3   :  { %v620_v33 = vsub.f32 1.0, %v619_v32 }
0x10b5   :  { %v621_v34 = vmul.f32 %v1738_v31, %v620_v33 }
0x10b7   :  { %v622_v35 = vadd.f32 %v1738_v31, %v621_v34 }
0x10b9   :  { %v626_v30 = vsel %vm625_vm3, %v1738_v31, %v622_v35 }
0x10ba   :  { %v631_v39 = vsel %vm628_vm4, %v630_v37, %v626_v30 }
0x10bb   :  { %v634_v41 = vmul.f32 %v631_v39, %v579_v15 }
0x1118   :  { %v637_v38 = vpop.permute.xlu1 %636 }
0x1119   :  { %v639_v40 = vmul.f32 %v637_v38, %v631_v39 }
0x111b   :  { %641 = vrot.lane.b32.xlu2 %v639_v40, %s1809_s4 }
0x111f   :  { %v743_v29 = vpop.f32.mrf.mxu1 }
0x1120   :  { %v744_v31 = vadd.f32 %v2058_v61, %v743_v29 }
0x1175   :  { %v642_v42 = vpop.permute.xlu2 %641 }
0x1176   :  { %v1983_v43 = vadd.f32 %v642_v42, %v634_v41 }
0x1178   :  { %1739 = vtanh.f32 %v1983_v43 }
0x117e   :  { %v1740_v44 = vpop.eup %1739 }
0x117f   :  { %647 = vrot.lane.b32.xlu0 %v1740_v44, %s1808_s0 }
0x11f1   :  { %v648_v49 = vpop.permute.xlu0 %647 }
0x11f2   :  { %v650_v26 = vmul.f32 %v648_v49, %v631_v39 }
0x11f4   :  { %660 = vrot.lane.b32.xlu1 %v650_v26, %s1809_s4 }
0x1266   :  { %v661_v50 = vpop.permute.xlu1 %660 }
0x1267   :  { %1633 = vmatmul.msk.f32.vlgmr.msrb.gmra.mxu3 %vm134_vm5, %v661_v50 }
0x1268   :  { %1004 = vmatpush.msrb.mxu3 %v2004_v51 }
0x126a   :  { %1005 = vmatpush.msrb.mxu3 %v2010_v52 }
0x126c   :  { %1006 = vmatpush.msrb.mxu3 %v2019_v54 }
0x126e   :  { %1007 = vmatpush.msrb.mxu3 %v2029_v56 }
0x12ea   :  { %v681_v59 = vpop.f32.mrf.mxu3 }
0x12eb   :  { %v682_v60 = vadd.f32 %v1674_v58, %v681_v59  ;;  %v746_v59 = vpop.f32.mrf.mxu1 }
0x12ed   :  { %1741 = vtanh.f32 %v682_v60  ;;  %v747_v60 = vadd.f32 %v2058_v61, %v746_v59 }
0x12f3   :  { %v1742_v22 = vpop.eup %1741 }
0x12f4   :  { %1642 = vmatmul.msk.f32.vlgmr.msra.gmra.mxu2 %vm134_vm5, %v1742_v22 }
0x12f5   :  { %1075 = vmatpush.msra.mxu2 %v2004_v51 }
0x12f7   :  { %1076 = vmatpush.msra.mxu2 %v2010_v52 }
0x12f9   :  { %1077 = vmatpush.msra.mxu2 %v2019_v54 }
0x12fb   :  { %1078 = vmatpush.msra.mxu2 %v2029_v56 }
0x1377   :  { %v797_v0 = vpop.f32.mrf.mxu2 }
0x1378   :  { %v800_v1 = vadd.f32 %v797_v0, %v741_v63 }
0x137a   :  { %1743 = vtanh.f32 %v800_v1  ;;  %v1643_v3 = vmul.f32 -1.442695, %v800_v1 }
0x137c   :  { %1745 = vpow2.f32 %v1643_v3 }
0x1380   :  { %v1744_v2 = vpop.eup %1743 }
0x1381   :  { %823 = vrot.lane.b32.xlu2 %v1744_v2, %s1808_s0 }
0x1382   :  { %v1746_v4 = vpop.eup %1745 }
0x1383   :  { %v804_v5 = vadd.f32 1.0, %v1746_v4 }
0x1385   :  { %1747 = vrcp.f32 %v804_v5  ;;  %v816_v10 = vand.u32 2147483648, %v804_v5  ;;  %vm810_vm7 = vweird.f32 %v804_v5  ;;  %v814_v11 = vand.u32 2147483647, %v804_v5 }
0x1387   :  { %v817_v13 = vor.u32 1.1754944e-38, %v816_v10  ;;  %vm815_vm9 = vcmp.eq.f32.partialorder %v814_v11, 8.507059e+37 }
0x138b   :  { %v1748_v6 = vpop.eup %1747 }
0x138c   :  { %v806_v7 = vmul.f32 %v1748_v6, %v804_v5  ;;  %vm811_vm6 = vweird.f32 %v1748_v6 }
0x138d   :  { %vm812_vm8 = vmor %vm810_vm7, %vm811_vm6 }
0x138e   :  { %v807_v8 = vsub.f32 1.0, %v806_v7 }
0x1390   :  { %v808_v28 = vmul.f32 %v1748_v6, %v807_v8 }
0x1392   :  { %v809_v9 = vadd.f32 %v1748_v6, %v808_v28 }
0x1394   :  { %v813_v12 = vsel %vm812_vm8, %v1748_v6, %v809_v9 }
0x1395   :  { %v818_v15 = vsel %vm815_vm9, %v817_v13, %v813_v12 }
0x1396   :  { %v821_v17 = vmul.f32 %v818_v15, %v1983_v43 }
0x13db   :  { %v824_v14 = vpop.permute.xlu2 %823 }
0x13dc   :  { %v826_v16 = vmul.f32 %v824_v14, %v818_v15 }
0x13de   :  { %828 = vrot.lane.b32.xlu0 %v826_v16, %s1809_s4 }
0x1450   :  { %v829_v18 = vpop.permute.xlu0 %828 }
0x1451   :  { %v831_v19 = vadd.f32 %v829_v18, %v821_v17 }
0x1453   :  { %1749 = vtanh.f32 %v831_v19 }
0x1459   :  { %v1750_v21 = vpop.eup %1749 }
0x145a   :  { %834 = vrot.lane.b32.xlu1 %v1750_v21, %s1808_s0  ;;  %v688_v21 = vld [vmem:[%s2466_s1 + $0x18] sm:$0xff] }
0x145b   :  { %1637 = vmatmul.msk.f32.gmra.mxu1 %vm55_vm0, %v688_v21 }
0x14cc   :  { %v835_v24 = vpop.permute.xlu1 %834 }
0x14cd   :  { %v837_v23 = vmul.f32 %v835_v24, %v818_v15 }
0x14cf   :  { %839 = vrot.lane.b32.xlu2 %v837_v23, %s1809_s4 }
0x14d8   :  { %v749_v23 = vpop.f32.mrf.mxu1 }
0x14d9   :  { %v750_v25 = vadd.f32 %v2058_v61, %v749_v23 }
0x1529   :  { %v840_v27 = vpop.permute.xlu2 %839 }
0x152a   :  { %842 = vst.msk [vmem:[#allocation3] sm:$0xff] %vm134_vm5, %v840_v27  ;;  %1644 = vmatmul.msk.f32.vlgmr.msra.gmra.mxu3 %vm134_vm5, %v840_v27 }
0x152b   :  { %1146 = vmatpush.msra.mxu3 %v2004_v51 }
0x152d   :  { %1147 = vmatpush.msra.mxu3 %v2010_v52 }
0x152f   :  { %1148 = vmatpush.msra.mxu3 %v2019_v54 }
0x1531   :  { %1149 = vmatpush.msra.mxu3 %v2029_v56 }
0x15ad   :  { %v867_v32 = vpop.f32.mrf.mxu3 }
0x15ae   :  { %v870_v33 = vadd.f32 %v867_v32, %v744_v31 }
0x15b0   :  { %1751 = vtanh.f32 %v870_v33  ;;  %v1645_v35 = vmul.f32 -1.442695, %v870_v33 }
0x15b2   :  { %1753 = vpow2.f32 %v1645_v35 }
0x15b6   :  { %v1752_v34 = vpop.eup %1751 }
0x15b7   :  { %893 = vrot.lane.b32.xlu0 %v1752_v34, %s1808_s0 }
0x15b8   :  { %v1754_v36 = vpop.eup %1753 }
0x15b9   :  { %v874_v20 = vadd.f32 1.0, %v1754_v36 }
0x15bb   :  { %1755 = vrcp.f32 %v874_v20  ;;  %v886_v41 = vand.u32 2147483648, %v874_v20  ;;  %vm880_vm11 = vweird.f32 %v874_v20  ;;  %v884_v42 = vand.u32 2147483647, %v874_v20 }
0x15bd   :  { %v887_v44 = vor.u32 1.1754944e-38, %v886_v41  ;;  %vm885_vm13 = vcmp.eq.f32.partialorder %v884_v42, 8.507059e+37 }
0x15c1   :  { %v1756_v30 = vpop.eup %1755 }
0x15c2   :  { %v876_v37 = vmul.f32 %v1756_v30, %v874_v20  ;;  %vm881_vm10 = vweird.f32 %v1756_v30 }
0x15c3   :  { %vm882_vm12 = vmor %vm880_vm11, %vm881_vm10 }
0x15c4   :  { %v877_v38 = vsub.f32 1.0, %v876_v37 }
0x15c6   :  { %v878_v39 = vmul.f32 %v1756_v30, %v877_v38 }
0x15c8   :  { %v879_v40 = vadd.f32 %v1756_v30, %v878_v39 }
0x15ca   :  { %v883_v43 = vsel %vm882_vm12, %v1756_v30, %v879_v40 }
0x15cb   :  { %v888_v46 = vsel %vm885_vm13, %v887_v44, %v883_v43 }
0x15cc   :  { %v891_v48 = vmul.f32 %v888_v46, %v831_v19 }
0x1629   :  { %v894_v45 = vpop.permute.xlu0 %893 }
0x162a   :  { %v896_v47 = vmul.f32 %v894_v45, %v888_v46 }
0x162c   :  { %898 = vrot.lane.b32.xlu1 %v896_v47, %s1809_s4  ;;  %v689_v47 = vld [vmem:[%s2466_s1 + $0x20] sm:$0xff] }
0x162d   :  { %1638 = vmatmul.msk.f32.gmra.mxu1 %vm55_vm0, %v689_v47 }
0x169e   :  { %v899_v49 = vpop.permute.xlu1 %898 }
0x169f   :  { %v901_v26 = vadd.f32 %v899_v49, %v891_v48 }
0x16a1   :  { %1757 = vtanh.f32 %v901_v26 }
0x16a7   :  { %v1758_v50 = vpop.eup %1757 }
0x16a8   :  { %904 = vrot.lane.b32.xlu2 %v1758_v50, %s1808_s0 }
0x16aa   :  { %v752_v49 = vpop.f32.mrf.mxu1 }
0x1702   :  { %v905_v53 = vpop.permute.xlu2 %904 }
0x1703   :  { %v907_v55 = vmul.f32 %v905_v53, %v888_v46 }
0x1705   :  { %909 = vrot.lane.b32.xlu0 %v907_v55, %s1809_s4 }
0x1777   :  { %v910_v58 = vpop.permute.xlu0 %909 }
0x1778   :  { %913 = vst.msk [vmem:[#allocation3 + $0x8] sm:$0xff] %vm134_vm5, %v910_v58  ;;  %1646 = vmatmul.msk.f32.vlgmr.msrb.gmra.mxu2 %vm134_vm5, %v910_v58 }
0x1779   :  { %1217 = vmatpush.msrb.mxu2 %v2004_v51 }
0x177b   :  { %1218 = vmatpush.msrb.mxu2 %v2010_v52 }
0x177d   :  { %1219 = vmatpush.msrb.mxu2 %v2019_v54 }
0x177f   :  { %1220 = vmatpush.msrb.mxu2 %v2029_v56  ;;  %v1341_v47 = vld [vmem:[#allocation3 + $0x8] sm:$0xff] }
0x17fb   :  { %v938_v22 = vpop.f32.mrf.mxu2 }
0x17fc   :  { %v941_v62 = vadd.f32 %v938_v22, %v747_v60 }
0x17fe   :  { %1759 = vtanh.f32 %v941_v62  ;;  %v1647_v0 = vmul.f32 -1.442695, %v941_v62 }
0x1800   :  { %1761 = vpow2.f32 %v1647_v0 }
0x1804   :  { %v1760_v63 = vpop.eup %1759 }
0x1805   :  { %964 = vrot.lane.b32.xlu1 %v1760_v63, %s1808_s0 }
0x1806   :  { %v1762_v1 = vpop.eup %1761 }
0x1807   :  { %v945_v2 = vadd.f32 1.0, %v1762_v1 }
0x1809   :  { %1763 = vrcp.f32 %v945_v2  ;;  %v957_v8 = vand.u32 2147483648, %v945_v2  ;;  %vm951_vm15 = vweird.f32 %v945_v2  ;;  %v955_v28 = vand.u32 2147483647, %v945_v2 }
0x180b   :  { %v958_v10 = vor.u32 1.1754944e-38, %v957_v8  ;;  %vm956_vm2 = vcmp.eq.f32.partialorder %v955_v28, 8.507059e+37 }
0x180f   :  { %v1764_v3 = vpop.eup %1763 }
0x1810   :  { %v947_v4 = vmul.f32 %v1764_v3, %v945_v2  ;;  %vm952_vm14 = vweird.f32 %v1764_v3 }
0x1811   :  { %vm953_vm1 = vmor %vm951_vm15, %vm952_vm14 }
0x1812   :  { %v948_v5 = vsub.f32 1.0, %v947_v4 }
0x1814   :  { %v949_v6 = vmul.f32 %v1764_v3, %v948_v5 }
0x1816   :  { %v950_v7 = vadd.f32 %v1764_v3, %v949_v6 }
0x1818   :  { %v954_v9 = vsel %vm953_vm1, %v1764_v3, %v950_v7  ;;  %vm1436_vm1 = vcmask 253952  }
0x1819   :  { %v959_v12 = vsel %vm956_vm2, %v958_v10, %v954_v9 }
0x181a   :  { %v962_v14 = vmul.f32 %v959_v12, %v901_v26  ;;  %v753_v26 = vadd.f32 %v2058_v61, %v752_v49 }
0x1877   :  { %v965_v11 = vpop.permute.xlu1 %964 }
0x1878   :  { %v967_v13 = vmul.f32 %v965_v11, %v959_v12 }
0x187a   :  { %969 = vrot.lane.b32.xlu2 %v967_v13, %s1809_s4  ;;  %v690_v13 = vld [vmem:[%s2466_s1 + $0x28] sm:$0xff] }
0x187b   :  { %1639 = vmatmul.msk.f32.gmra.mxu1 %vm55_vm0, %v690_v13 }
0x18d4   :  { %v970_v15 = vpop.permute.xlu2 %969 }
0x18d5   :  { %v972_v16 = vadd.f32 %v970_v15, %v962_v14 }
0x18d7   :  { %1765 = vtanh.f32 %v972_v16 }
0x18dd   :  { %v1766_v17 = vpop.eup %1765 }
0x18de   :  { %975 = vrot.lane.b32.xlu0 %v1766_v17, %s1808_s0 }
0x18f8   :  { %v755_v15 = vpop.f32.mrf.mxu1 }
0x1950   :  { %v976_v18 = vpop.permute.xlu0 %975 }
0x1951   :  { %v978_v19 = vmul.f32 %v976_v18, %v959_v12 }
0x1953   :  { %980 = vrot.lane.b32.xlu1 %v978_v19, %s1809_s4 }
0x19c5   :  { %v981_v24 = vpop.permute.xlu1 %980 }
0x19c6   :  { %984 = vst.msk [vmem:[#allocation3 + $0x10] sm:$0xff] %vm134_vm5, %v981_v24  ;;  %1648 = vmatmul.msk.f32.vlgmr.msrb.gmra.mxu3 %vm134_vm5, %v981_v24 }
0x19c7   :  { %1288 = vmatpush.msrb.mxu3 %v2004_v51 }
0x19c9   :  { %1289 = vmatpush.msrb.mxu3 %v2010_v52 }
0x19cb   :  { %1290 = vmatpush.msrb.mxu3 %v2019_v54 }
0x19cd   :  { %1291 = vmatpush.msrb.mxu3 %v2029_v56 }
0x1a49   :  { %v1009_v27 = vpop.f32.mrf.mxu3 }
0x1a4a   :  { %v1012_v29 = vadd.f32 %v1009_v27, %v750_v25 }
0x1a4c   :  { %1767 = vtanh.f32 %v1012_v29  ;;  %v1649_v32 = vmul.f32 -1.442695, %v1012_v29 }
0x1a4e   :  { %1769 = vpow2.f32 %v1649_v32 }
0x1a52   :  { %v1768_v31 = vpop.eup %1767 }
0x1a53   :  { %1035 = vrot.lane.b32.xlu2 %v1768_v31, %s1808_s0 }
0x1a54   :  { %v1770_v33 = vpop.eup %1769 }
0x1a55   :  { %v1016_v34 = vadd.f32 1.0, %v1770_v33 }
0x1a57   :  { %1771 = vrcp.f32 %v1016_v34  ;;  %v1028_v56 = vand.u32 2147483648, %v1016_v34  ;;  %vm1022_vm4 = vweird.f32 %v1016_v34  ;;  %v1026_v20 = vand.u32 2147483647, %v1016_v34 }
0x1a59   :  { %v1029_v37 = vor.u32 1.1754944e-38, %v1028_v56  ;;  %vm1027_vm7 = vcmp.eq.f32.partialorder %v1026_v20, 8.507059e+37 }
0x1a5d   :  { %v1772_v51 = vpop.eup %1771 }
0x1a5e   :  { %v1018_v52 = vmul.f32 %v1772_v51, %v1016_v34  ;;  %vm1023_vm3 = vweird.f32 %v1772_v51 }
0x1a5f   :  { %vm1024_vm6 = vmor %vm1022_vm4, %vm1023_vm3 }
0x1a60   :  { %v1019_v35 = vsub.f32 1.0, %v1018_v52 }
0x1a62   :  { %v1020_v54 = vmul.f32 %v1772_v51, %v1019_v35 }
0x1a64   :  { %v1021_v36 = vadd.f32 %v1772_v51, %v1020_v54 }
0x1a66   :  { %v1025_v30 = vsel %vm1024_vm6, %v1772_v51, %v1021_v36 }
0x1a67   :  { %v1030_v39 = vsel %vm1027_vm7, %v1029_v37, %v1025_v30 }
0x1a68   :  { %v1033_v41 = vmul.f32 %v1030_v39, %v972_v16  ;;  %v756_v16 = vadd.f32 %v2058_v61, %v755_v15 }
0x1aad   :  { %v1036_v38 = vpop.permute.xlu2 %1035 }
0x1aae   :  { %v1038_v40 = vmul.f32 %v1036_v38, %v1030_v39 }
0x1ab0   :  { %1040 = vrot.lane.b32.xlu0 %v1038_v40, %s1809_s4  ;;  %v1351_v40 = vld [vmem:[%s2467_s10 + $0x18] sm:$0xff] }
0x1b22   :  { %v1041_v42 = vpop.permute.xlu0 %1040 }
0x1b23   :  { %v1043_v43 = vadd.f32 %v1041_v42, %v1033_v41  ;;  %v1350_v41 = vld [vmem:[%s2467_s10 + $0x10] sm:$0xff] }
0x1b24   :  { %v691_v42 = vld [vmem:[%s2466_s1 + $0x30] sm:$0xff] }
0x1b25   :  { %1773 = vtanh.f32 %v1043_v43  ;;  %1640 = vmatmul.msk.f32.gmra.mxu1 %vm55_vm0, %v691_v42 }
0x1b2b   :  { %v1774_v44 = vpop.eup %1773 }
0x1b2c   :  { %1046 = vrot.lane.b32.xlu1 %v1774_v44, %s1808_s0  ;;  %v1348_v44 = vld [vmem:[%s2467_s10] sm:$0xff] }
0x1b9e   :  { %v1047_v45 = vpop.permute.xlu1 %1046 }
0x1b9f   :  { %v1049_v46 = vmul.f32 %v1047_v45, %v1030_v39 }
0x1ba1   :  { %1051 = vrot.lane.b32.xlu2 %v1049_v46, %s1809_s4  ;;  %v1340_v46 = vld [vmem:[#allocation3] sm:$0xff] }
0x1bfb   :  { %v1052_v48 = vpop.permute.xlu2 %1051 }
0x1bfc   :  { %1055 = vst.msk [vmem:[#allocation3 + $0x18] sm:$0xff] %vm134_vm5, %v1052_v48  ;;  %1650 = vmatmul.msk.f32.vlgmr.msra.gmra.mxu2 %vm134_vm5, %v1052_v48  ;;  %v1342_v48 = vld [vmem:[#allocation3 + $0x10] sm:$0xff] }
0x1bfd   :  { %1392 = vmatpush.msra.mxu2 %v1351_v40 }
0x1bff   :  { %1393 = vmatpush.msra.mxu2 %v1350_v41 }
0x1c03   :  { %v1343_v49 = vld [vmem:[#allocation3 + $0x18] sm:$0xff] }
0x1c7f   :  { %v1080_v50 = vpop.f32.mrf.mxu2 }
0x1c80   :  { %v1083_v53 = vadd.f32 %v1080_v50, %v753_v26  ;;  %v758_v26 = vpop.f32.mrf.mxu1 }
0x1c81   :  { %v759_v50 = vadd.f32 %v2058_v61, %v758_v26 }
0x1c82   :  { %1775 = vtanh.f32 %v1083_v53  ;;  %v1651_v57 = vmul.f32 -1.442695, %v1083_v53 }
0x1c84   :  { %1777 = vpow2.f32 %v1651_v57  ;;  %v2165_v57 = vld [vmem:[%s2468_s11] ss:$0 sm:$0xff] }
0x1c88   :  { %v1776_v55 = vpop.eup %1775 }
0x1c89   :  { %1106 = vrot.lane.b32.xlu0 %v1776_v55, %s1808_s0 }
0x1c8a   :  { %v1778_v58 = vpop.eup %1777 }
0x1c8b   :  { %v1087_v59 = vadd.f32 1.0, %v1778_v58 }
0x1c8d   :  { %1779 = vrcp.f32 %v1087_v59  ;;  %v1099_v1 = vand.u32 2147483648, %v1087_v59  ;;  %vm1093_vm9 = vweird.f32 %v1087_v59  ;;  %v1097_v2 = vand.u32 2147483647, %v1087_v59 }
0x1c8f   :  { %v1100_v4 = vor.u32 1.1754944e-38, %v1099_v1  ;;  %vm1098_vm11 = vcmp.eq.f32.partialorder %v1097_v2, 8.507059e+37 }
0x1c93   :  { %v1780_v60 = vpop.eup %1779 }
0x1c94   :  { %v1089_v22 = vmul.f32 %v1780_v60, %v1087_v59  ;;  %vm1094_vm8 = vweird.f32 %v1780_v60 }
0x1c95   :  { %vm1095_vm10 = vmor %vm1093_vm9, %vm1094_vm8 }
0x1c96   :  { %v1090_v62 = vsub.f32 1.0, %v1089_v22 }
0x1c98   :  { %v1091_v63 = vmul.f32 %v1780_v60, %v1090_v62 }
0x1c9a   :  { %v1092_v0 = vadd.f32 %v1780_v60, %v1091_v63 }
0x1c9c   :  { %v1096_v3 = vsel %vm1095_vm10, %v1780_v60, %v1092_v0 }
0x1c9d   :  { %v1101_v6 = vsel %vm1098_vm11, %v1100_v4, %v1096_v3 }
0x1c9e   :  { %v1104_v8 = vmul.f32 %v1101_v6, %v1043_v43  ;;  %v1349_v43 = vld [vmem:[%s2467_s10 + $0x8] sm:$0xff] }
0x1c9f   :  { %1394 = vmatpush.msra.mxu2 %v1349_v43 }
0x1ca1   :  { %1395 = vmatpush.msra.mxu2 %v1348_v44 }
0x1cfb   :  { %v1107_v5 = vpop.permute.xlu0 %1106 }
0x1cfc   :  { %v1109_v7 = vmul.f32 %v1107_v5, %v1101_v6 }
0x1cfe   :  { %1111 = vrot.lane.b32.xlu1 %v1109_v7, %s1809_s4 }
0x1d70   :  { %v1112_v28 = vpop.permute.xlu1 %1111 }
0x1d71   :  { %v1114_v9 = vadd.f32 %v1112_v28, %v1104_v8 }
0x1d73   :  { %1781 = vtanh.f32 %v1114_v9 }
0x1d79   :  { %v1782_v10 = vpop.eup %1781 }
0x1d7a   :  { %1117 = vrot.lane.b32.xlu2 %v1782_v10, %s1808_s0 }
0x1dd4   :  { %v1118_v11 = vpop.permute.xlu2 %1117 }
0x1dd5   :  { %v1120_v12 = vmul.f32 %v1118_v11, %v1101_v6 }
0x1dd7   :  { %1122 = vrot.lane.b32.xlu0 %v1120_v12, %s1809_s4 }
0x1e49   :  { %v1123_v14 = vpop.permute.xlu0 %1122 }
0x1e4a   :  { %1126 = vst.msk [vmem:[#allocation3 + $0x20] sm:$0xff] %vm134_vm5, %v1123_v14  ;;  %1652 = vmatmul.msk.f32.vlgmr.msra.gmra.mxu3 %vm134_vm5, %v1123_v14 }
0x1e4b   :  { %1666 = vmatpush.msra.mxu3 %v1351_v40 }
0x1e4d   :  { %1667 = vmatpush.msra.mxu3 %v1350_v41 }
0x1e4f   :  { %1668 = vmatpush.msra.mxu3 %v1349_v43 }
0x1e51   :  { %1669 = vmatpush.msra.mxu3 %v1348_v44 }
0x1ecd   :  { %v1151_v17 = vpop.f32.mrf.mxu3 }
0x1ece   :  { %v1154_v18 = vadd.f32 %v1151_v17, %v756_v16 }
0x1ed0   :  { %1783 = vtanh.f32 %v1154_v18  ;;  %v1653_v21 = vmul.f32 -1.442695, %v1154_v18 }
0x1ed2   :  { %1785 = vpow2.f32 %v1653_v21 }
0x1ed6   :  { %v1784_v19 = vpop.eup %1783 }
0x1ed7   :  { %1177 = vrot.lane.b32.xlu1 %v1784_v19, %s1808_s0 }
0x1ed8   :  { %v1786_v24 = vpop.eup %1785 }
0x1ed9   :  { %v1158_v23 = vadd.f32 1.0, %v1786_v24 }
0x1edb   :  { %1787 = vrcp.f32 %v1158_v23  ;;  %v1170_v33 = vand.u32 2147483648, %v1158_v23  ;;  %vm1164_vm13 = vweird.f32 %v1158_v23  ;;  %v1168_v34 = vand.u32 2147483647, %v1158_v23 }
0x1edd   :  { %v1171_v52 = vor.u32 1.1754944e-38, %v1170_v33  ;;  %vm1169_vm15 = vcmp.eq.f32.partialorder %v1168_v34, 8.507059e+37 }
0x1ee1   :  { %v1788_v25 = vpop.eup %1787 }
0x1ee2   :  { %v1160_v27 = vmul.f32 %v1788_v25, %v1158_v23  ;;  %vm1165_vm12 = vweird.f32 %v1788_v25 }
0x1ee3   :  { %vm1166_vm14 = vmor %vm1164_vm13, %vm1165_vm12 }
0x1ee4   :  { %v1161_v29 = vsub.f32 1.0, %v1160_v27 }
0x1ee6   :  { %v1162_v31 = vmul.f32 %v1788_v25, %v1161_v29 }
0x1ee8   :  { %v1163_v32 = vadd.f32 %v1788_v25, %v1162_v31 }
0x1eea   :  { %v1167_v51 = vsel %vm1166_vm14, %v1788_v25, %v1163_v32 }
0x1eeb   :  { %v1172_v54 = vsel %vm1169_vm15, %v1171_v52, %v1167_v51 }
0x1eec   :  { %v1175_v56 = vmul.f32 %v1172_v54, %v1114_v9 }
0x1f49   :  { %v1178_v35 = vpop.permute.xlu1 %1177 }
0x1f4a   :  { %v1180_v36 = vmul.f32 %v1178_v35, %v1172_v54 }
0x1f4c   :  { %1182 = vrot.lane.b32.xlu2 %v1180_v36, %s1809_s4 }
0x1fa6   :  { %v1183_v20 = vpop.permute.xlu2 %1182 }
0x1fa7   :  { %v2131_v30 = vadd.f32 %v1183_v20, %v1175_v56 }
0x1fa9   :  { %1789 = vtanh.f32 %v2131_v30 }
0x1faf   :  { %v1790_v37 = vpop.eup %1789 }
0x1fb0   :  { %1188 = vrot.lane.b32.xlu0 %v1790_v37, %s1808_s0 }
0x2022   :  { %v1189_v38 = vpop.permute.xlu0 %1188 }
0x2023   :  { %v1191_v39 = vmul.f32 %v1189_v38, %v1172_v54 }
0x2025   :  { %1193 = vrot.lane.b32.xlu1 %v1191_v39, %s1809_s4 }
0x2097   :  { %v1194_v45 = vpop.permute.xlu1 %1193 }
0x2098   :  { %1197 = vst.msk [vmem:[#allocation3 + $0x28] sm:$0xff] %vm134_vm5, %v1194_v45  ;;  %1654 = vmatmul.msk.f32.vlgmr.msrb.gmra.mxu2 %vm134_vm5, %v1194_v45 }
0x20a0   :  { %1658 = vmatmul.msk.f32.vlgmr.msra.gmra.mxu2 %vm134_vm5, %v1340_v46 }
0x20a8   :  { %1659 = vmatmul.msk.f32.gmra.mxu2 %vm134_vm5, %v1341_v47 }
0x20b0   :  { %1660 = vmatmul.msk.f32.gmra.mxu2 %vm134_vm5, %v1342_v48 }
0x20b8   :  { %1661 = vmatmul.msk.f32.gmra.mxu2 %vm134_vm5, %v1343_v49 }
0x211b   :  { %v1222_v53 = vpop.f32.mrf.mxu2 }
0x211c   :  { %v2159_v55 = vadd.f32 %v1222_v53, %v759_v50  ;;  %v692_v50 = vld [vmem:[%s2466_s1 + $0x38] sm:$0xff] }
0x211d   :  { %1641 = vmatmul.msk.f32.gmra.mxu1 %vm55_vm0, %v692_v50 }
0x211e   :  { %1791 = vtanh.f32 %v2159_v55  ;;  %v1655_v51 = vmul.f32 -1.442695, %v2159_v55  ;;  %v1345_v55 = vld [vmem:[#allocation3 + $0x28] sm:$0xff] }
0x2120   :  { %1793 = vpow2.f32 %v1655_v51 }
0x2123   :  { %v1397_v58 = vpop.f32.mrf.mxu2 }
0x2124   :  { %v1792_v59 = vpop.eup %1791  ;;  %v1398_v60 = vadd.f32 %v2165_v57, %v1397_v58 }
0x2125   :  { %1248 = vrot.lane.b32.xlu2 %v1792_v59, %s1808_s0 }
0x2126   :  { %v1422_v22 = vrot.slane %v1398_v60, 1  ;;  %v1423_v62 = vrot.slane %v1398_v60, 2  ;;  %v1424_v63 = vrot.slane %v1398_v60, 3  ;;  %1437 = vst.msk [vmem:[%s2469_s12] sm:$0x1] %vm1436_vm1, %v1398_v60  ;;  %v1425_v0 = vrot.slane %v1398_v60, 4  ;;  %v1794_v52 = vpop.eup %1793 }
0x2127   :  { %v1426_v1 = vrot.slane %v1398_v60, 5  ;;  %v1427_v2 = vrot.slane %v1398_v60, 6  ;;  %v1428_v3 = vrot.slane %v1398_v60, 7  ;;  %v1229_v35 = vadd.f32 1.0, %v1794_v52 }
0x2128   :  { %1438 = vst.msk [vmem:[%s2469_s12 + $0x8] sm:$0x1] %vm1436_vm1, %v1422_v22 }
0x2129   :  { %1439 = vst.msk [vmem:[%s2469_s12 + $0x10] sm:$0x1] %vm1436_vm1, %v1423_v62  ;;  %1795 = vrcp.f32 %v1229_v35  ;;  %v1241_v38 = vand.u32 2147483648, %v1229_v35  ;;  %vm1235_vm3 = vweird.f32 %v1229_v35  ;;  %v1239_v39 = vand.u32 2147483647, %v1229_v35 }
0x212a   :  { %1440 = vst.msk [vmem:[%s2469_s12 + $0x18] sm:$0x1] %vm1436_vm1, %v1424_v63 }
0x212b   :  { %1441 = vst.msk [vmem:[%s2469_s12 + $0x20] sm:$0x1] %vm1436_vm1, %v1425_v0  ;;  %v1400_v4 = vpop.f32.mrf.mxu2  ;;  %v1242_v41 = vor.u32 1.1754944e-38, %v1241_v38  ;;  %vm1240_vm6 = vcmp.eq.f32.partialorder %v1239_v39, 8.507059e+37 }
0x212c   :  { %1442 = vst.msk [vmem:[%s2469_s12 + $0x28] sm:$0x1] %vm1436_vm1, %v1426_v1  ;;  %v1401_v5 = vadd.f32 %v2165_v57, %v1400_v4 }
0x212d   :  { %1443 = vst.msk [vmem:[%s2469_s12 + $0x30] sm:$0x1] %vm1436_vm1, %v1427_v2 }
0x212e   :  { %1444 = vst.msk [vmem:[%s2469_s12 + $0x38] sm:$0x1] %vm1436_vm1, %v1428_v3  ;;  %v1446_v6 = vrot.slane %v1401_v5, 1  ;;  %v1447_v7 = vrot.slane %v1401_v5, 2  ;;  %v1448_v8 = vrot.slane %v1401_v5, 3  ;;  %v1449_v28 = vrot.slane %v1401_v5, 4 }
0x212f   :  { %1460 = vst.msk [vmem:[%s2469_s12 + $0x1] sm:$0x1] %vm1436_vm1, %v1401_v5  ;;  %v1450_v9 = vrot.slane %v1401_v5, 5  ;;  %v1451_v10 = vrot.slane %v1401_v5, 6  ;;  %v1452_v11 = vrot.slane %v1401_v5, 7  ;;  %v1796_v54 = vpop.eup %1795 }
0x2130   :  { %1461 = vst.msk [vmem:[%s2469_s12 + $0x9] sm:$0x1] %vm1436_vm1, %v1446_v6  ;;  %v1231_v36 = vmul.f32 %v1796_v54, %v1229_v35  ;;  %vm1236_vm2 = vweird.f32 %v1796_v54 }
0x2131   :  { %1462 = vst.msk [vmem:[%s2469_s12 + $0x11] sm:$0x1] %vm1436_vm1, %v1447_v7  ;;  %vm1237_vm4 = vmor %vm1235_vm3, %vm1236_vm2 }
0x2132   :  { %1463 = vst.msk [vmem:[%s2469_s12 + $0x19] sm:$0x1] %vm1436_vm1, %v1448_v8  ;;  %v1232_v56 = vsub.f32 1.0, %v1231_v36 }
0x2133   :  { %1464 = vst.msk [vmem:[%s2469_s12 + $0x21] sm:$0x1] %vm1436_vm1, %v1449_v28  ;;  %v1403_v12 = vpop.f32.mrf.mxu2 }
0x2134   :  { %1465 = vst.msk [vmem:[%s2469_s12 + $0x29] sm:$0x1] %vm1436_vm1, %v1450_v9  ;;  %v1404_v13 = vadd.f32 %v2165_v57, %v1403_v12  ;;  %v1233_v20 = vmul.f32 %v1796_v54, %v1232_v56 }
0x2135   :  { %1466 = vst.msk [vmem:[%s2469_s12 + $0x31] sm:$0x1] %vm1436_vm1, %v1451_v10 }
0x2136   :  { %1467 = vst.msk [vmem:[%s2469_s12 + $0x39] sm:$0x1] %vm1436_vm1, %v1452_v11  ;;  %v1469_v14 = vrot.slane %v1404_v13, 1  ;;  %v1470_v15 = vrot.slane %v1404_v13, 2  ;;  %v1471_v16 = vrot.slane %v1404_v13, 3  ;;  %v1472_v17 = vrot.slane %v1404_v13, 4 }
0x2137   :  { %1483 = vst.msk [vmem:[%s2469_s12 + $0x2] sm:$0x1] %vm1436_vm1, %v1404_v13  ;;  %v1473_v18 = vrot.slane %v1404_v13, 5  ;;  %v1474_v19 = vrot.slane %v1404_v13, 6  ;;  %v1475_v21 = vrot.slane %v1404_v13, 7  ;;  %v1234_v37 = vadd.f32 %v1796_v54, %v1233_v20 }
0x2138   :  { %1484 = vst.msk [vmem:[%s2469_s12 + $0xa] sm:$0x1] %vm1436_vm1, %v1469_v14 }
0x2139   :  { %1485 = vst.msk [vmem:[%s2469_s12 + $0x12] sm:$0x1] %vm1436_vm1, %v1470_v15  ;;  %v1238_v40 = vsel %vm1237_vm4, %v1796_v54, %v1234_v37 }
0x213a   :  { %1486 = vst.msk [vmem:[%s2469_s12 + $0x1a] sm:$0x1] %vm1436_vm1, %v1471_v16  ;;  %v1243_v43 = vsel %vm1240_vm6, %v1242_v41, %v1238_v40 }
0x213b   :  { %1487 = vst.msk [vmem:[%s2469_s12 + $0x22] sm:$0x1] %vm1436_vm1, %v1472_v17  ;;  %v1406_v24 = vpop.f32.mrf.mxu2  ;;  %v1246_v45 = vmul.f32 %v1243_v43, %v2131_v30  ;;  %v1344_v30 = vld [vmem:[#allocation3 + $0x20] sm:$0xff] }
0x213c   :  { %1488 = vst.msk [vmem:[%s2469_s12 + $0x2a] sm:$0x1] %vm1436_vm1, %v1473_v18  ;;  %v1407_v23 = vadd.f32 %v2165_v57, %v1406_v24 }
0x213d   :  { %1489 = vst.msk [vmem:[%s2469_s12 + $0x32] sm:$0x1] %vm1436_vm1, %v1474_v19 }
0x213e   :  { %1490 = vst.msk [vmem:[%s2469_s12 + $0x3a] sm:$0x1] %vm1436_vm1, %v1475_v21  ;;  %v1492_v25 = vrot.slane %v1407_v23, 1  ;;  %v1493_v27 = vrot.slane %v1407_v23, 2  ;;  %v1494_v29 = vrot.slane %v1407_v23, 3  ;;  %v1495_v31 = vrot.slane %v1407_v23, 4 }
0x213f   :  { %1506 = vst.msk [vmem:[%s2469_s12 + $0x3] sm:$0x1] %vm1436_vm1, %v1407_v23  ;;  %v1496_v32 = vrot.slane %v1407_v23, 5  ;;  %v1497_v33 = vrot.slane %v1407_v23, 6  ;;  %v1498_v34 = vrot.slane %v1407_v23, 7 }
0x2140   :  { %1507 = vst.msk [vmem:[%s2469_s12 + $0xb] sm:$0x1] %vm1436_vm1, %v1492_v25 }
0x2141   :  { %1508 = vst.msk [vmem:[%s2469_s12 + $0x13] sm:$0x1] %vm1436_vm1, %v1493_v27 }
0x2142   :  { %1509 = vst.msk [vmem:[%s2469_s12 + $0x1b] sm:$0x1] %vm1436_vm1, %v1494_v29 }
0x2143   :  { %1510 = vst.msk [vmem:[%s2469_s12 + $0x23] sm:$0x1] %vm1436_vm1, %v1495_v31 }
0x2144   :  { %1511 = vst.msk [vmem:[%s2469_s12 + $0x2b] sm:$0x1] %vm1436_vm1, %v1496_v32 }
0x2145   :  { %1512 = vst.msk [vmem:[%s2469_s12 + $0x33] sm:$0x1] %vm1436_vm1, %v1497_v33 }
0x2146   :  { %1513 = vst.msk [vmem:[%s2469_s12 + $0x3b] sm:$0x1] %vm1436_vm1, %v1498_v34 }
0x217f   :  { %v1249_v42 = vpop.permute.xlu2 %1248 }
0x2180   :  { %v1251_v44 = vmul.f32 %v1249_v42, %v1243_v43 }
0x2182   :  { %1253 = vrot.lane.b32.xlu0 %v1251_v44, %s1809_s4 }
0x219a   :  { %v761_v59 = vpop.f32.mrf.mxu1 }
0x219b   :  { %v762_v60 = vadd.f32 %v2058_v61, %v761_v59 }
0x21f4   :  { %v1254_v46 = vpop.permute.xlu0 %1253 }
0x21f5   :  { %v2303_v47 = vadd.f32 %v1254_v46, %v1246_v45 }
0x21f7   :  { %1797 = vtanh.f32 %v2303_v47 }
0x21fd   :  { %v1798_v48 = vpop.eup %1797 }
0x21fe   :  { %1259 = vrot.lane.b32.xlu1 %v1798_v48, %s1808_s0 }
0x2270   :  { %v1260_v49 = vpop.permute.xlu1 %1259 }
0x2271   :  { %v1262_v26 = vmul.f32 %v1260_v49, %v1243_v43 }
0x2273   :  { %1264 = vrot.lane.b32.xlu2 %v1262_v26, %s1809_s4 }
0x22cd   :  { %v1265_v53 = vpop.permute.xlu2 %1264 }
0x22ce   :  { %1268 = vst.msk [vmem:[#allocation3 + $0x30] sm:$0xff] %vm134_vm5, %v1265_v53  ;;  %1656 = vmatmul.msk.f32.vlgmr.msrb.gmra.mxu3 %vm134_vm5, %v1265_v53 }
0x22d5   :  { %v1346_v58 = vld [vmem:[#allocation3 + $0x30] sm:$0xff] }
0x22d6   :  { %1662 = vmatmul.msk.f32.vlgmr.msra.gmra.mxu3 %vm134_vm5, %v1344_v30 }
0x22de   :  { %1663 = vmatmul.msk.f32.gmra.mxu3 %vm134_vm5, %v1345_v55 }
0x22e6   :  { %1664 = vmatmul.msk.f32.gmra.mxu3 %vm134_vm5, %v1346_v58 }
0x2351   :  { %v1293_v22 = vpop.f32.mrf.mxu3 }
0x2352   :  { %v1296_v62 = vadd.f32 %v1293_v22, %v762_v60 }
0x2354   :  { %1799 = vtanh.f32 %v1296_v62  ;;  %v1657_v29 = vmul.f32 -1.442695, %v1296_v62 }
0x2356   :  { %1801 = vpow2.f32 %v1657_v29 }
0x2359   :  { %v1409_v63 = vpop.f32.mrf.mxu3 }
0x235a   :  { %v1800_v0 = vpop.eup %1799  ;;  %v1410_v1 = vadd.f32 %v2165_v57, %v1409_v63 }
0x235b   :  { %1319 = vrot.lane.b32.xlu0 %v1800_v0, %s1808_s0 }
0x235c   :  { %v1515_v2 = vrot.slane %v1410_v1, 1  ;;  %v1516_v3 = vrot.slane %v1410_v1, 2  ;;  %v1517_v4 = vrot.slane %v1410_v1, 3  ;;  %1529 = vst.msk [vmem:[%s2469_s12 + $0x4] sm:$0x1] %vm1436_vm1, %v1410_v1  ;;  %v1518_v5 = vrot.slane %v1410_v1, 4  ;;  %v1802_v31 = vpop.eup %1801 }
0x235d   :  { %v1519_v6 = vrot.slane %v1410_v1, 5  ;;  %v1520_v61 = vrot.slane %v1410_v1, 6  ;;  %v1521_v7 = vrot.slane %v1410_v1, 7  ;;  %v1300_v32 = vadd.f32 1.0, %v1802_v31 }
0x235e   :  { %1530 = vst.msk [vmem:[%s2469_s12 + $0xc] sm:$0x1] %vm1436_vm1, %v1515_v2 }
0x235f   :  { %1531 = vst.msk [vmem:[%s2469_s12 + $0x14] sm:$0x1] %vm1436_vm1, %v1516_v3  ;;  %1803 = vrcp.f32 %v1300_v32  ;;  %v1312_v54 = vand.u32 2147483648, %v1300_v32  ;;  %vm1306_vm7 = vweird.f32 %v1300_v32  ;;  %v1310_v36 = vand.u32 2147483647, %v1300_v32 }
0x2360   :  { %1532 = vst.msk [vmem:[%s2469_s12 + $0x1c] sm:$0x1] %vm1436_vm1, %v1517_v4 }
0x2361   :  { %1533 = vst.msk [vmem:[%s2469_s12 + $0x24] sm:$0x1] %vm1436_vm1, %v1518_v5  ;;  %v1412_v8 = vpop.f32.mrf.mxu3  ;;  %v1313_v20 = vor.u32 1.1754944e-38, %v1312_v54  ;;  %vm1311_vm9 = vcmp.eq.f32.partialorder %v1310_v36, 8.507059e+37 }
0x2362   :  { %1534 = vst.msk [vmem:[%s2469_s12 + $0x2c] sm:$0x1] %vm1436_vm1, %v1519_v6  ;;  %v1413_v28 = vadd.f32 %v2165_v57, %v1412_v8 }
0x2363   :  { %1535 = vst.msk [vmem:[%s2469_s12 + $0x34] sm:$0x1] %vm1436_vm1, %v1520_v61 }
0x2364   :  { %1536 = vst.msk [vmem:[%s2469_s12 + $0x3c] sm:$0x1] %vm1436_vm1, %v1521_v7  ;;  %v1538_v9 = vrot.slane %v1413_v28, 1  ;;  %v1539_v10 = vrot.slane %v1413_v28, 2  ;;  %v1540_v11 = vrot.slane %v1413_v28, 3  ;;  %v1541_v12 = vrot.slane %v1413_v28, 4 }
0x2365   :  { %1552 = vst.msk [vmem:[%s2469_s12 + $0x5] sm:$0x1] %vm1436_vm1, %v1413_v28  ;;  %v1542_v13 = vrot.slane %v1413_v28, 5  ;;  %v1543_v14 = vrot.slane %v1413_v28, 6  ;;  %v1544_v15 = vrot.slane %v1413_v28, 7  ;;  %v1804_v33 = vpop.eup %1803 }
0x2366   :  { %1553 = vst.msk [vmem:[%s2469_s12 + $0xd] sm:$0x1] %vm1436_vm1, %v1538_v9  ;;  %v1302_v34 = vmul.f32 %v1804_v33, %v1300_v32  ;;  %vm1307_vm0 = vweird.f32 %v1804_v33 }
0x2367   :  { %1554 = vst.msk [vmem:[%s2469_s12 + $0x15] sm:$0x1] %vm1436_vm1, %v1539_v10  ;;  %vm1308_vm8 = vmor %vm1306_vm7, %vm1307_vm0 }
0x2368   :  { %1555 = vst.msk [vmem:[%s2469_s12 + $0x1d] sm:$0x1] %vm1436_vm1, %v1540_v11  ;;  %v1303_v51 = vsub.f32 1.0, %v1302_v34 }
0x2369   :  { %1556 = vst.msk [vmem:[%s2469_s12 + $0x25] sm:$0x1] %vm1436_vm1, %v1541_v12  ;;  %v1415_v16 = vpop.f32.mrf.mxu3 }
0x236a   :  { %1557 = vst.msk [vmem:[%s2469_s12 + $0x2d] sm:$0x1] %vm1436_vm1, %v1542_v13  ;;  %v1416_v17 = vadd.f32 %v2165_v57, %v1415_v16  ;;  %v1304_v52 = vmul.f32 %v1804_v33, %v1303_v51 }
0x236b   :  { %1558 = vst.msk [vmem:[%s2469_s12 + $0x35] sm:$0x1] %vm1436_vm1, %v1543_v14 }
0x236c   :  { %1559 = vst.msk [vmem:[%s2469_s12 + $0x3d] sm:$0x1] %vm1436_vm1, %v1544_v15  ;;  %v1561_v18 = vrot.slane %v1416_v17, 1  ;;  %v1562_v19 = vrot.slane %v1416_v17, 2  ;;  %v1563_v21 = vrot.slane %v1416_v17, 3  ;;  %v1564_v24 = vrot.slane %v1416_v17, 4 }
0x236d   :  { %1575 = vst.msk [vmem:[%s2469_s12 + $0x6] sm:$0x1] %vm1436_vm1, %v1416_v17  ;;  %v1565_v23 = vrot.slane %v1416_v17, 5  ;;  %v1566_v25 = vrot.slane %v1416_v17, 6  ;;  %v1567_v27 = vrot.slane %v1416_v17, 7  ;;  %v1305_v35 = vadd.f32 %v1804_v33, %v1304_v52 }
0x236e   :  { %1576 = vst.msk [vmem:[%s2469_s12 + $0xe] sm:$0x1] %vm1436_vm1, %v1561_v18 }
0x236f   :  { %1577 = vst.msk [vmem:[%s2469_s12 + $0x16] sm:$0x1] %vm1436_vm1, %v1562_v19  ;;  %v1309_v56 = vsel %vm1308_vm8, %v1804_v33, %v1305_v35 }
0x2370   :  { %1578 = vst.msk [vmem:[%s2469_s12 + $0x1e] sm:$0x1] %vm1436_vm1, %v1563_v21  ;;  %v1314_v38 = vsel %vm1311_vm9, %v1313_v20, %v1309_v56 }
0x2371   :  { %1579 = vst.msk [vmem:[%s2469_s12 + $0x26] sm:$0x1] %vm1436_vm1, %v1564_v24  ;;  %v1317_v40 = vmul.f32 %v1314_v38, %v2303_v47 }
0x2372   :  { %1580 = vst.msk [vmem:[%s2469_s12 + $0x2e] sm:$0x1] %vm1436_vm1, %v1565_v23 }
0x2373   :  { %1581 = vst.msk [vmem:[%s2469_s12 + $0x36] sm:$0x1] %vm1436_vm1, %v1566_v25 }
0x2374   :  { %1582 = vst.msk [vmem:[%s2469_s12 + $0x3e] sm:$0x1] %vm1436_vm1, %v1567_v27 }
0x23cd   :  { %v1320_v37 = vpop.permute.xlu0 %1319 }
0x23ce   :  { %v1322_v39 = vmul.f32 %v1320_v37, %v1314_v38 }
0x23d0   :  { %1324 = vrot.lane.b32.xlu1 %v1322_v39, %s1809_s4 }
0x2442   :  { %v1325_v41 = vpop.permute.xlu1 %1324 }
0x2443   :  { %v1327_v42 = vadd.f32 %v1325_v41, %v1317_v40 }
0x2445   :  { %1805 = vtanh.f32 %v1327_v42 }
0x244b   :  { %v1806_v43 = vpop.eup %1805 }
0x244c   :  { %1330 = vrot.lane.b32.xlu2 %v1806_v43, %s1808_s0 }
0x24a6   :  { %v1331_v44 = vpop.permute.xlu2 %1330 }
0x24a7   :  { %v1333_v45 = vmul.f32 %v1331_v44, %v1314_v38 }
0x24a9   :  { %1335 = vrot.lane.b32.xlu0 %v1333_v45, %s1809_s4 }
0x251b   :  { %v1336_v46 = vpop.permute.xlu0 %1335 }
0x251c   :  { %1339 = vst.msk [vmem:[#allocation3 + $0x38] sm:$0xff] %vm134_vm5, %v1336_v46 }
0x2523   :  { %v1347_v48 = vld [vmem:[#allocation3 + $0x38] sm:$0xff] }
0x2524   :  { %1665 = vmatmul.msk.f32.gmra.mxu3 %vm134_vm5, %v1347_v48 }
0x25a7   :  { %v1418_v49 = vpop.f32.mrf.mxu3 }
0x25a8   :  { %v1419_v26 = vadd.f32 %v2165_v57, %v1418_v49 }
0x25aa   :  { %v1584_v47 = vrot.slane %v1419_v26, 1  ;;  %v1585_v50 = vrot.slane %v1419_v26, 2  ;;  %v1586_v53 = vrot.slane %v1419_v26, 3  ;;  %1598 = vst.msk [vmem:[%s2469_s12 + $0x7] sm:$0x1] %vm1436_vm1, %v1419_v26  ;;  %v1587_v30 = vrot.slane %v1419_v26, 4 }
0x25ab   :  { %v1588_v55 = vrot.slane %v1419_v26, 5  ;;  %v1589_v58 = vrot.slane %v1419_v26, 6  ;;  %v1590_v57 = vrot.slane %v1419_v26, 7 }
0x25ac   :  { %1599 = vst.msk [vmem:[%s2469_s12 + $0xf] sm:$0x1] %vm1436_vm1, %v1584_v47 }
0x25ad   :  { %1600 = vst.msk [vmem:[%s2469_s12 + $0x17] sm:$0x1] %vm1436_vm1, %v1585_v50 }
0x25ae   :  { %1601 = vst.msk [vmem:[%s2469_s12 + $0x1f] sm:$0x1] %vm1436_vm1, %v1586_v53 }
0x25af   :  { %1602 = vst.msk [vmem:[%s2469_s12 + $0x27] sm:$0x1] %vm1436_vm1, %v1587_v30 }
0x25b0   :  { %1603 = vst.msk [vmem:[%s2469_s12 + $0x2f] sm:$0x1] %vm1436_vm1, %v1588_v55 }
0x25b1   :  { %1604 = vst.msk [vmem:[%s2469_s12 + $0x37] sm:$0x1] %vm1436_vm1, %v1589_v58 }
0x25b2   :  { %1605 = vst.msk [vmem:[%s2469_s12 + $0x3f] sm:$0x1] %vm1436_vm1, %v1590_v57 }

</bundles_post_ra>
